<compile_context>
chip_gen: v6e
topology: v6e:2x2x1
jax: 0.10.0
libtpu: 0.0.40
codegen_flags: <defaults>
</compile_context>

<pallas_src>
import functools

import jax
import jax.numpy as jnp
from jax.experimental import pallas as pl
from jax.experimental.pallas import tpu as pltpu


# ----------------------------- kernel ------------------------------------ #

def tsmixer_fused_kernel(x_ref,
                         wt1_ref, bt1_ref, wt2_ref, bt2_ref,
                         wc1_ref, bc1_ref, wc2_ref, bc2_ref,
                         wp_ref, bp_ref,
                         o_ref, *, compute_dtype, unroll_layers):
    """Full TSMixer forward for one batch tile.

    x_ref : [TB, C, Lp]  activation, lane-dense in (padded) seq_len, f32
    o_ref : [TB, CO, Lp] lane-dense output (wrapper transposes / slices back)
    Weights are stacked along a leading layer axis E, fully VMEM-resident,
    stored in `compute_dtype` (bf16 by default); biases stay f32.
    """
    TB, C, Lp = x_ref.shape
    CO = o_ref.shape[1]
    E = wt1_ref.shape[0]
    cdt = compute_dtype

    def resblock(x, wt1, bt1, wt2, bt2, wc1, bc1, wc2, bc2):
        # ---- temporal mixing: Linear(L->D) -> ReLU -> Linear(D->L) ------
        xt = x.reshape(TB * C, Lp)                      # fold batch into M
        h = jnp.maximum(
            jnp.dot(xt.astype(cdt), wt1,
                    preferred_element_type=jnp.float32) + bt1, 0.0)
        t = jnp.dot(h.astype(cdt), wt2,
                    preferred_element_type=jnp.float32) + bt2
        x = x + t.reshape(TB, C, Lp)                    # residual (dropout=id)

        # ---- channel mixing: Linear(C->D) -> ReLU -> Linear(D->C) -------
        xc = jnp.swapaxes(x, 1, 2).reshape(TB * Lp, C)  # single layout flip
        h = jnp.maximum(
            jnp.dot(xc.astype(cdt), wc1,
                    preferred_element_type=jnp.float32) + bc1, 0.0)
        c = jnp.dot(h.astype(cdt), wc2,
                    preferred_element_type=jnp.float32) + bc2
        return xc + c                                   # channel layout, f32

    x = x_ref[...]                                      # [TB, C, Lp] f32

    if unroll_layers:
        # Small E: static unroll, skip the redundant flip after the last layer.
        xc = None
        for e in range(E):
            xc = resblock(x, wt1_ref[e], bt1_ref[e], wt2_ref[e], bt2_ref[e],
                          wc1_ref[e], bc1_ref[e], wc2_ref[e], bc2_ref[e])
            if e + 1 < E:
                x = jnp.swapaxes(xc.reshape(TB, Lp, C), 1, 2)
    else:
        # Large E: fori_loop bounds live ranges (vreg / internal VMEM pressure).
        def body(e, xcur):
            xc_e = resblock(xcur, wt1_ref[e], bt1_ref[e], wt2_ref[e],
                            bt2_ref[e], wc1_ref[e], bc1_ref[e], wc2_ref[e],
                            bc2_ref[e])
            return jnp.swapaxes(xc_e.reshape(TB, Lp, C), 1, 2)
        x = jax.lax.fori_loop(0, E, body, x)
        xc = jnp.swapaxes(x, 1, 2).reshape(TB * Lp, C)

    # ---- projection head: Linear(C -> CO) per time step, fused ----------
    # TODO(synk): OutputBlock source not provided; implemented as
    # Dropout(eval=id) + Linear(enc_in -> c_out) applied at every time step.
    p = jnp.dot(xc.astype(cdt), wp_ref[...],
                preferred_element_type=jnp.float32) + bp_ref[...]
    o_ref[...] = jnp.swapaxes(p.reshape(TB, Lp, CO), 1, 2)   # lane-dense out


# ----------------------- sizing helpers (host side) ------------------------ #

def _round_up(n, m):
    return ((n + m - 1) // m) * m


def _vmem_estimate_bytes(tb, Lp, C, D, CO, E, w_bytes, weight_bufs):
    """Rough resident-VMEM estimate for one grid step."""
    f32 = 4
    mat_w = E * (Lp * D + D * Lp + C * D + D * C) + C * CO
    bias_w = E * (D + Lp + D + C) + CO
    weights = weight_bufs * (mat_w * w_bytes + bias_w * f32)
    io = 2 * tb * C * Lp * f32 + 2 * tb * CO * Lp * f32     # dbl-buffered x/out
    tmp = (tb * C * Lp            # x
           + tb * C * D           # temporal hidden
           + tb * C * Lp          # temporal out
           + tb * Lp * C          # xc
           + tb * Lp * D          # channel hidden
           + tb * Lp * C          # channel out
           + tb * Lp * CO)        # projection out
    return weights + io + int(tmp * f32 * 1.5)              # 1.5x layout margin


def _vmem_capacity_bytes():
    try:
        return int(pltpu.get_tpu_info().vmem_capacity_bytes)
    except Exception:
        return 64 * 1024 * 1024          # conservative (v7x per-TC) fallback


def _choose_batch_tile(B, budget, est):
    divisors = [d for d in range(1, B + 1) if B % d == 0]
    # Prefer >= 2 grid steps so both v7x TCs work and tile DMAs pipeline.
    preferred = [d for d in divisors if B // d >= 2] or divisors
    tb = preferred[0]
    for d in preferred:                  # ascending -> largest fitting wins
        if est(d) <= budget:
            tb = d
    return tb


# ----------------------------- wrapper ------------------------------------ #

def tsmixer_forward(x, params, *, batch_tile=None,
                    compute_dtype=jnp.bfloat16, lane_pad=True,
                    unroll_max_layers=8):
    """x: [B, L, C] float32. Returns [B, L, c_out] float32."""
    B, L, C = x.shape
    E, _, D = params['wt1'].shape
    CO = params['wp'].shape[1]

    # -- lane padding of seq_len (output/activation lane axis) -------------
    Lp = _round_up(L, 128) if lane_pad else L
    pad = Lp - L

    wt1, wt2, bt2 = params['wt1'], params['wt2'], params['bt2']
    if pad:
        wt1 = jnp.pad(wt1, ((0, 0), (0, pad), (0, 0)))   # extra L rows = 0
        wt2 = jnp.pad(wt2, ((0, 0), (0, 0), (0, pad)))   # extra L cols = 0
        bt2 = jnp.pad(bt2, ((0, 0), (0, 0), (0, pad)))   # extra L cols = 0

    # Weights in compute dtype (bf16 halves DMA/VMEM); biases stay f32.
    wdt = compute_dtype
    wt1 = wt1.astype(wdt)
    wt2 = wt2.astype(wdt)
    wc1 = params['wc1'].astype(wdt)
    wc2 = params['wc2'].astype(wdt)
    wp = params['wp'].astype(wdt)
    bt1, bc1, bc2, bp = (params['bt1'], params['bc1'], params['bc2'],
                         params['bp'])

    # Entry transpose + pad in the wrapper (XLA): enter lane-dense in L.
    x_t = jnp.swapaxes(x, 1, 2)                          # [B, C, L]
    if pad:
        x_t = jnp.pad(x_t, ((0, 0), (0, 0), (0, pad)))   # [B, C, Lp]

    # -- generation-aware VMEM budget & batch-tile choice -------------------
    cap = _vmem_capacity_bytes()
    budget = int(cap * 0.75)
    w_bytes = jnp.dtype(wdt).itemsize
    est = lambda tb: _vmem_estimate_bytes(tb, Lp, C, D, CO, E, w_bytes,
                                          weight_bufs=1)
    if batch_tile is None:
        TB = _choose_batch_tile(B, budget, est)
    else:
        TB = batch_tile
        assert B % TB == 0, "batch_tile must divide batch"
    vmem_limit = int(min(cap * 0.85, max(est(TB) * 1.5, 32 * 1024 * 1024)))

    kernel = functools.partial(tsmixer_fused_kernel,
                               compute_dtype=compute_dtype,
                               unroll_layers=(E <= unroll_max_layers))

    def build(single_buffer_weights):
        def wspec(shape):
            # Grid-invariant weights: request a single buffer (no pointless
            # double-buffering of tensors that never change across steps).
            if single_buffer_weights:
                return pl.BlockSpec(shape,
                                    lambda i, _n=len(shape): (0,) * _n,
                                    pipeline_mode=pl.Buffered(1))
            return pl.BlockSpec(shape, lambda i, _n=len(shape): (0,) * _n)

        return pl.pallas_call(
            kernel,
            out_shape=jax.ShapeDtypeStruct((B, CO, Lp), jnp.float32),
            grid=(B // TB,),
            in_specs=[
                pl.BlockSpec((TB, C, Lp), lambda i: (i, 0, 0)),  # x batch tile
                wspec((E, Lp, D)),        # wt1
                wspec((E, 1, D)),         # bt1
                wspec((E, D, Lp)),        # wt2
                wspec((E, 1, Lp)),        # bt2
                wspec((E, C, D)),         # wc1
                wspec((E, 1, D)),         # bc1
                wspec((E, D, C)),         # wc2
                wspec((E, 1, C)),         # bc2
                wspec((C, CO)),           # wp
                wspec((1, CO)),           # bp
            ],
            out_specs=pl.BlockSpec((TB, CO, Lp), lambda i: (i, 0, 0)),
            compiler_params=pltpu.CompilerParams(
                dimension_semantics=("parallel",),   # shard batch tiles
                vmem_limit_bytes=vmem_limit),
        )

    args = (x_t, wt1, bt1, wt2, bt2, wc1, bc1, wc2, bc2, wp, bp)
    try:
        out_t = build(True)(*args)
    except Exception:
        # Fallback for JAX builds where pipeline_mode=pl.Buffered(1) is not
        # supported on the top-level grid pipeline: default (double) buffering.
        out_t = build(False)(*args)

    # Exit transpose in the wrapper; slice off the lane pad.
    out = jnp.swapaxes(out_t, 1, 2)                      # [B, Lp, CO]
    return out[:, :L, :] if pad else out


# -------------------------- pure-JAX reference ---------------------------- #

def tsmixer_ref(x, params):
    E = params['wt1'].shape[0]
    for e in range(E):
        xT = jnp.swapaxes(x, 1, 2)
        t = jnp.maximum(xT @ params['wt1'][e] + params['bt1'][e], 0.0)
        t = t @ params['wt2'][e] + params['bt2'][e]
        x = x + jnp.swapaxes(t, 1, 2)
        c = jnp.maximum(x @ params['wc1'][e] + params['bc1'][e], 0.0)
        c = c @ params['wc2'][e] + params['bc2'][e]
        x = x + c
    return x @ params['wp'] + params['bp']


# ----------------------------- parameters --------------------------------- #

def init_params(key, e_layers, seq_len, enc_in, d_model, c_out):
    ks = jax.random.split(key, 10)
    u = lambda k, shape, fan_in: jax.random.uniform(
        k, shape, jnp.float32, -1.0 / jnp.sqrt(fan_in), 1.0 / jnp.sqrt(fan_in))
    return {
        # temporal MLP (acts on seq_len axis)
        'wt1': u(ks[0], (e_layers, seq_len, d_model), seq_len),
        'bt1': u(ks[1], (e_layers, 1, d_model), seq_len),
        'wt2': u(ks[2], (e_layers, d_model, seq_len), d_model),
        'bt2': u(ks[3], (e_layers, 1, seq_len), d_model),
        # channel MLP (acts on enc_in axis)
        'wc1': u(ks[4], (e_layers, enc_in, d_model), enc_in),
        'bc1': u(ks[5], (e_layers, 1, d_model), enc_in),
        'wc2': u(ks[6], (e_layers, d_model, enc_in), d_model),
        'bc2': u(ks[7], (e_layers, 1, enc_in), d_model),
        # projection head
        'wp': u(ks[8], (enc_in, c_out), enc_in),
        'bp': u(ks[9], (1, c_out), enc_in),
    }


if __name__ == "__main__":
    # Small demo config (launch/padding bound; real tuning needs production
    # dims: L, D multiples of 128, TB*C / TB*L multiples of 8-16).
    B, L, C, D, E, CO = 2, 8, 4, 32, 2, 2

    key = jax.random.PRNGKey(0)
    kx, kp = jax.random.split(key)
    x_enc = jax.random.normal(kx, (B, L, C), jnp.float32)
    params = init_params(kp, E, L, C, D, CO)

    ref = tsmixer_ref(x_enc, params)

    # Exact-parity check: f32 MXU operands (structure / padding correctness).
    out_f32 = jax.block_until_ready(
        tsmixer_forward(x_enc, params, compute_dtype=jnp.float32))
    assert out_f32.shape == (B, L, CO)
    assert jnp.allclose(out_f32, ref, atol=1e-4, rtol=1e-4)

    # Default fast path: bf16 MXU operands with f32 accumulation/elementwise
    # (looser tolerance expected vs. the f32 reference).
    out_bf16 = jax.block_until_ready(tsmixer_forward(x_enc, params))
    assert out_bf16.shape == (B, L, CO)
    assert jnp.allclose(out_bf16, ref, atol=5e-2, rtol=5e-2)

    print("KERNEL_OK")
</pallas_src>

<mosaic_0001>
module attributes {stable_mosaic.version = 11 : i64} {
  func.func @tsmixer_fused_kernel(%arg0: i32, %arg1: memref<1x4x128xf32, #tpu.memory_space<vmem>>, %arg2: memref<2x128x32xf32, #tpu.memory_space<vmem>>, %arg3: memref<2x1x32xf32, #tpu.memory_space<vmem>>, %arg4: memref<2x32x128xf32, #tpu.memory_space<vmem>>, %arg5: memref<2x1x128xf32, #tpu.memory_space<vmem>>, %arg6: memref<2x4x32xf32, #tpu.memory_space<vmem>>, %arg7: memref<2x1x32xf32, #tpu.memory_space<vmem>>, %arg8: memref<2x32x4xf32, #tpu.memory_space<vmem>>, %arg9: memref<2x1x4xf32, #tpu.memory_space<vmem>>, %arg10: memref<4x2xf32, #tpu.memory_space<vmem>>, %arg11: memref<1x2xf32, #tpu.memory_space<vmem>>, %arg12: memref<1x2x128xf32, #tpu.memory_space<vmem>>) attributes {dimension_semantics = [#tpu.dimension_semantics<parallel>], iteration_bounds = array<i64: 2>, scalar_prefetch = 0 : i64, scratch_operands = 0 : i64, tpu.core_type = #tpu.core_type<tc>, window_params = [{transform_indices = @transform_0, window_bounds = array<i64: 1, 4, 128>}, {pipeline_mode = #tpu.pipeline_mode<synchronous>, transform_indices = @transform_1, window_bounds = array<i64: 2, 128, 32>}, {pipeline_mode = #tpu.pipeline_mode<synchronous>, transform_indices = @transform_2, window_bounds = array<i64: 2, 1, 32>}, {pipeline_mode = #tpu.pipeline_mode<synchronous>, transform_indices = @transform_3, window_bounds = array<i64: 2, 32, 128>}, {pipeline_mode = #tpu.pipeline_mode<synchronous>, transform_indices = @transform_4, window_bounds = array<i64: 2, 1, 128>}, {pipeline_mode = #tpu.pipeline_mode<synchronous>, transform_indices = @transform_5, window_bounds = array<i64: 2, 4, 32>}, {pipeline_mode = #tpu.pipeline_mode<synchronous>, transform_indices = @transform_6, window_bounds = array<i64: 2, 1, 32>}, {pipeline_mode = #tpu.pipeline_mode<synchronous>, transform_indices = @transform_7, window_bounds = array<i64: 2, 32, 4>}, {pipeline_mode = #tpu.pipeline_mode<synchronous>, transform_indices = @transform_8, window_bounds = array<i64: 2, 1, 4>}, {pipeline_mode = #tpu.pipeline_mode<synchronous>, transform_indices = @transform_9, window_bounds = array<i64: 4, 2>}, {pipeline_mode = #tpu.pipeline_mode<synchronous>, transform_indices = @transform_10, window_bounds = array<i64: 1, 2>}, {transform_indices = @transform_11, window_bounds = array<i64: 1, 2, 128>}]} {
    %c0 = arith.constant 0 : index
    %c0_0 = arith.constant 0 : index
    %c0_1 = arith.constant 0 : index
    %0 = vector.load %arg1[%c0, %c0_0, %c0_1] : memref<1x4x128xf32, #tpu.memory_space<vmem>>, vector<1x4x128xf32>
    %c0_2 = arith.constant 0 : index
    %c0_3 = arith.constant 0 : index
    %c0_4 = arith.constant 0 : index
    %1 = vector.load %arg2[%c0_2, %c0_3, %c0_4] : memref<2x128x32xf32, #tpu.memory_space<vmem>>, vector<1x128x32xf32>
    %2 = vector.shape_cast %1 : vector<1x128x32xf32> to vector<128x32xf32>
    %c0_5 = arith.constant 0 : index
    %c0_6 = arith.constant 0 : index
    %c0_7 = arith.constant 0 : index
    %3 = vector.load %arg3[%c0_5, %c0_6, %c0_7] : memref<2x1x32xf32, #tpu.memory_space<vmem>>, vector<1x1x32xf32>
    %4 = vector.shape_cast %3 : vector<1x1x32xf32> to vector<1x32xf32>
    %c0_8 = arith.constant 0 : index
    %c0_9 = arith.constant 0 : index
    %c0_10 = arith.constant 0 : index
    %5 = vector.load %arg4[%c0_8, %c0_9, %c0_10] : memref<2x32x128xf32, #tpu.memory_space<vmem>>, vector<1x32x128xf32>
    %6 = vector.shape_cast %5 : vector<1x32x128xf32> to vector<32x128xf32>
    %c0_11 = arith.constant 0 : index
    %c0_12 = arith.constant 0 : index
    %c0_13 = arith.constant 0 : index
    %7 = vector.load %arg5[%c0_11, %c0_12, %c0_13] : memref<2x1x128xf32, #tpu.memory_space<vmem>>, vector<1x1x128xf32>
    %8 = vector.shape_cast %7 : vector<1x1x128xf32> to vector<1x128xf32>
    %c0_14 = arith.constant 0 : index
    %c0_15 = arith.constant 0 : index
    %c0_16 = arith.constant 0 : index
    %9 = vector.load %arg6[%c0_14, %c0_15, %c0_16] : memref<2x4x32xf32, #tpu.memory_space<vmem>>, vector<1x4x32xf32>
    %10 = vector.shape_cast %9 : vector<1x4x32xf32> to vector<4x32xf32>
    %c0_17 = arith.constant 0 : index
    %c0_18 = arith.constant 0 : index
    %c0_19 = arith.constant 0 : index
    %11 = vector.load %arg7[%c0_17, %c0_18, %c0_19] : memref<2x1x32xf32, #tpu.memory_space<vmem>>, vector<1x1x32xf32>
    %12 = vector.shape_cast %11 : vector<1x1x32xf32> to vector<1x32xf32>
    %c0_20 = arith.constant 0 : index
    %c0_21 = arith.constant 0 : index
    %c0_22 = arith.constant 0 : index
    %13 = vector.load %arg8[%c0_20, %c0_21, %c0_22] : memref<2x32x4xf32, #tpu.memory_space<vmem>>, vector<1x32x4xf32>
    %14 = vector.shape_cast %13 : vector<1x32x4xf32> to vector<32x4xf32>
    %c0_23 = arith.constant 0 : index
    %c0_24 = arith.constant 0 : index
    %c0_25 = arith.constant 0 : index
    %15 = vector.load %arg9[%c0_23, %c0_24, %c0_25] : memref<2x1x4xf32, #tpu.memory_space<vmem>>, vector<1x1x4xf32>
    %16 = vector.shape_cast %15 : vector<1x1x4xf32> to vector<1x4xf32>
    %17 = vector.shape_cast %0 : vector<1x4x128xf32> to vector<4x128xf32>
    %cst = arith.constant dense<0.000000e+00> : vector<4x32xf32>
    %18 = tpu.matmul %17, %2, %cst {dimension_numbers = #tpu.dot_dimension_numbers<[1], [0], [0], [1], [0, 0, 1, 1], [], []>} : vector<4x128xf32>, vector<128x32xf32>, vector<4x32xf32> -> vector<4x32xf32>
    %19 = vector.broadcast %4 : vector<1x32xf32> to vector<4x32xf32>
    %20 = arith.addf %18, %19 : vector<4x32xf32>
    %cst_26 = arith.constant 0.000000e+00 : f32
    %21 = vector.broadcast %cst_26 : f32 to vector<4x32xf32>
    %22 = arith.maximumf %20, %21 : vector<4x32xf32>
    %cst_27 = arith.constant dense<0.000000e+00> : vector<4x128xf32>
    %23 = tpu.matmul %22, %6, %cst_27 {dimension_numbers = #tpu.dot_dimension_numbers<[1], [0], [0], [1], [0, 0, 1, 1], [], []>} : vector<4x32xf32>, vector<32x128xf32>, vector<4x128xf32> -> vector<4x128xf32>
    %24 = vector.broadcast %8 : vector<1x128xf32> to vector<4x128xf32>
    %25 = arith.addf %23, %24 : vector<4x128xf32>
    %26 = vector.shape_cast %25 : vector<4x128xf32> to vector<1x4x128xf32>
    %27 = arith.addf %0, %26 : vector<1x4x128xf32>
    %28 = tpu.transpose %27, [0, 2, 1] : vector<1x4x128xf32> -> vector<1x128x4xf32>
    %29 = vector.shape_cast %28 : vector<1x128x4xf32> to vector<128x4xf32>
    %cst_28 = arith.constant dense<0.000000e+00> : vector<128x32xf32>
    %30 = tpu.matmul %29, %10, %cst_28 {dimension_numbers = #tpu.dot_dimension_numbers<[1], [0], [0], [1], [0, 0, 1, 1], [], []>} : vector<128x4xf32>, vector<4x32xf32>, vector<128x32xf32> -> vector<128x32xf32>
    %31 = vector.broadcast %12 : vector<1x32xf32> to vector<128x32xf32>
    %32 = arith.addf %30, %31 : vector<128x32xf32>
    %cst_29 = arith.constant 0.000000e+00 : f32
    %33 = vector.broadcast %cst_29 : f32 to vector<128x32xf32>
    %34 = arith.maximumf %32, %33 : vector<128x32xf32>
    %cst_30 = arith.constant dense<0.000000e+00> : vector<128x4xf32>
    %35 = tpu.matmul %34, %14, %cst_30 {dimension_numbers = #tpu.dot_dimension_numbers<[1], [0], [0], [1], [0, 0, 1, 1], [], []>} : vector<128x32xf32>, vector<32x4xf32>, vector<128x4xf32> -> vector<128x4xf32>
    %36 = vector.broadcast %16 : vector<1x4xf32> to vector<128x4xf32>
    %37 = arith.addf %35, %36 : vector<128x4xf32>
    %38 = arith.addf %29, %37 : vector<128x4xf32>
    %39 = vector.shape_cast %38 : vector<128x4xf32> to vector<1x128x4xf32>
    %40 = tpu.transpose %39, [0, 2, 1] : vector<1x128x4xf32> -> vector<1x4x128xf32>
    %c1 = arith.constant 1 : index
    %c0_31 = arith.constant 0 : index
    %c0_32 = arith.constant 0 : index
    %41 = vector.load %arg2[%c1, %c0_31, %c0_32] : memref<2x128x32xf32, #tpu.memory_space<vmem>>, vector<1x128x32xf32>
    %42 = vector.shape_cast %41 : vector<1x128x32xf32> to vector<128x32xf32>
    %c1_33 = arith.constant 1 : index
    %c0_34 = arith.constant 0 : index
    %c0_35 = arith.constant 0 : index
    %43 = vector.load %arg3[%c1_33, %c0_34, %c0_35] : memref<2x1x32xf32, #tpu.memory_space<vmem>>, vector<1x1x32xf32>
    %44 = vector.shape_cast %43 : vector<1x1x32xf32> to vector<1x32xf32>
    %c1_36 = arith.constant 1 : index
    %c0_37 = arith.constant 0 : index
    %c0_38 = arith.constant 0 : index
    %45 = vector.load %arg4[%c1_36, %c0_37, %c0_38] : memref<2x32x128xf32, #tpu.memory_space<vmem>>, vector<1x32x128xf32>
    %46 = vector.shape_cast %45 : vector<1x32x128xf32> to vector<32x128xf32>
    %c1_39 = arith.constant 1 : index
    %c0_40 = arith.constant 0 : index
    %c0_41 = arith.constant 0 : index
    %47 = vector.load %arg5[%c1_39, %c0_40, %c0_41] : memref<2x1x128xf32, #tpu.memory_space<vmem>>, vector<1x1x128xf32>
    %48 = vector.shape_cast %47 : vector<1x1x128xf32> to vector<1x128xf32>
    %c1_42 = arith.constant 1 : index
    %c0_43 = arith.constant 0 : index
    %c0_44 = arith.constant 0 : index
    %49 = vector.load %arg6[%c1_42, %c0_43, %c0_44] : memref<2x4x32xf32, #tpu.memory_space<vmem>>, vector<1x4x32xf32>
    %50 = vector.shape_cast %49 : vector<1x4x32xf32> to vector<4x32xf32>
    %c1_45 = arith.constant 1 : index
    %c0_46 = arith.constant 0 : index
    %c0_47 = arith.constant 0 : index
    %51 = vector.load %arg7[%c1_45, %c0_46, %c0_47] : memref<2x1x32xf32, #tpu.memory_space<vmem>>, vector<1x1x32xf32>
    %52 = vector.shape_cast %51 : vector<1x1x32xf32> to vector<1x32xf32>
    %c1_48 = arith.constant 1 : index
    %c0_49 = arith.constant 0 : index
    %c0_50 = arith.constant 0 : index
    %53 = vector.load %arg8[%c1_48, %c0_49, %c0_50] : memref<2x32x4xf32, #tpu.memory_space<vmem>>, vector<1x32x4xf32>
    %54 = vector.shape_cast %53 : vector<1x32x4xf32> to vector<32x4xf32>
    %c1_51 = arith.constant 1 : index
    %c0_52 = arith.constant 0 : index
    %c0_53 = arith.constant 0 : index
    %55 = vector.load %arg9[%c1_51, %c0_52, %c0_53] : memref<2x1x4xf32, #tpu.memory_space<vmem>>, vector<1x1x4xf32>
    %56 = vector.shape_cast %55 : vector<1x1x4xf32> to vector<1x4xf32>
    %57 = vector.shape_cast %40 : vector<1x4x128xf32> to vector<4x128xf32>
    %cst_54 = arith.constant dense<0.000000e+00> : vector<4x32xf32>
    %58 = tpu.matmul %57, %42, %cst_54 {dimension_numbers = #tpu.dot_dimension_numbers<[1], [0], [0], [1], [0, 0, 1, 1], [], []>} : vector<4x128xf32>, vector<128x32xf32>, vector<4x32xf32> -> vector<4x32xf32>
    %59 = vector.broadcast %44 : vector<1x32xf32> to vector<4x32xf32>
    %60 = arith.addf %58, %59 : vector<4x32xf32>
    %cst_55 = arith.constant 0.000000e+00 : f32
    %61 = vector.broadcast %cst_55 : f32 to vector<4x32xf32>
    %62 = arith.maximumf %60, %61 : vector<4x32xf32>
    %cst_56 = arith.constant dense<0.000000e+00> : vector<4x128xf32>
    %63 = tpu.matmul %62, %46, %cst_56 {dimension_numbers = #tpu.dot_dimension_numbers<[1], [0], [0], [1], [0, 0, 1, 1], [], []>} : vector<4x32xf32>, vector<32x128xf32>, vector<4x128xf32> -> vector<4x128xf32>
    %64 = vector.broadcast %48 : vector<1x128xf32> to vector<4x128xf32>
    %65 = arith.addf %63, %64 : vector<4x128xf32>
    %66 = vector.shape_cast %65 : vector<4x128xf32> to vector<1x4x128xf32>
    %67 = arith.addf %40, %66 : vector<1x4x128xf32>
    %68 = tpu.transpose %67, [0, 2, 1] : vector<1x4x128xf32> -> vector<1x128x4xf32>
    %69 = vector.shape_cast %68 : vector<1x128x4xf32> to vector<128x4xf32>
    %cst_57 = arith.constant dense<0.000000e+00> : vector<128x32xf32>
    %70 = tpu.matmul %69, %50, %cst_57 {dimension_numbers = #tpu.dot_dimension_numbers<[1], [0], [0], [1], [0, 0, 1, 1], [], []>} : vector<128x4xf32>, vector<4x32xf32>, vector<128x32xf32> -> vector<128x32xf32>
    %71 = vector.broadcast %52 : vector<1x32xf32> to vector<128x32xf32>
    %72 = arith.addf %70, %71 : vector<128x32xf32>
    %cst_58 = arith.constant 0.000000e+00 : f32
    %73 = vector.broadcast %cst_58 : f32 to vector<128x32xf32>
    %74 = arith.maximumf %72, %73 : vector<128x32xf32>
    %cst_59 = arith.constant dense<0.000000e+00> : vector<128x4xf32>
    %75 = tpu.matmul %74, %54, %cst_59 {dimension_numbers = #tpu.dot_dimension_numbers<[1], [0], [0], [1], [0, 0, 1, 1], [], []>} : vector<128x32xf32>, vector<32x4xf32>, vector<128x4xf32> -> vector<128x4xf32>
    %76 = vector.broadcast %56 : vector<1x4xf32> to vector<128x4xf32>
    %77 = arith.addf %75, %76 : vector<128x4xf32>
    %78 = arith.addf %69, %77 : vector<128x4xf32>
    %c0_60 = arith.constant 0 : index
    %c0_61 = arith.constant 0 : index
    %79 = vector.load %arg10[%c0_60, %c0_61] : memref<4x2xf32, #tpu.memory_space<vmem>>, vector<4x2xf32>
    %cst_62 = arith.constant dense<0.000000e+00> : vector<128x2xf32>
    %80 = tpu.matmul %78, %79, %cst_62 {dimension_numbers = #tpu.dot_dimension_numbers<[1], [0], [0], [1], [0, 0, 1, 1], [], []>} : vector<128x4xf32>, vector<4x2xf32>, vector<128x2xf32> -> vector<128x2xf32>
    %c0_63 = arith.constant 0 : index
    %c0_64 = arith.constant 0 : index
    %81 = vector.load %arg11[%c0_63, %c0_64] : memref<1x2xf32, #tpu.memory_space<vmem>>, vector<1x2xf32>
    %82 = vector.broadcast %81 : vector<1x2xf32> to vector<128x2xf32>
    %83 = arith.addf %80, %82 : vector<128x2xf32>
    %84 = vector.shape_cast %83 : vector<128x2xf32> to vector<1x128x2xf32>
    %85 = tpu.transpose %84, [0, 2, 1] : vector<1x128x2xf32> -> vector<1x2x128xf32>
    %c0_65 = arith.constant 0 : index
    %c0_66 = arith.constant 0 : index
    %c0_67 = arith.constant 0 : index
    %86 = vector.load %arg12[%c0_65, %c0_66, %c0_67] : memref<1x2x128xf32, #tpu.memory_space<vmem>>, vector<1x2x128xf32>
    tpu.vector_store %arg12[%c0_65, %c0_66, %c0_67], %85 {strides = array<i32>} : memref<1x2x128xf32, #tpu.memory_space<vmem>>, vector<1x2x128xf32>,
    return
  }
  func.func @transform_0(%arg0: i32) -> (i32, i32, i32) {
    %c0_i32 = arith.constant 0 : i32
    %c0_i32_0 = arith.constant 0 : i32
    %c0_i32_1 = arith.constant 0 : i32
    return %arg0, %c0_i32, %c0_i32_0 : i32, i32, i32
  }
  func.func @transform_1(%arg0: i32) -> (i32, i32, i32) {
    %c0_i32 = arith.constant 0 : i32
    %c0_i32_0 = arith.constant 0 : i32
    %c0_i32_1 = arith.constant 0 : i32
    %c0_i32_2 = arith.constant 0 : i32
    return %c0_i32, %c0_i32_0, %c0_i32_1 : i32, i32, i32
  }
  func.func @transform_2(%arg0: i32) -> (i32, i32, i32) {
    %c0_i32 = arith.constant 0 : i32
    %c0_i32_0 = arith.constant 0 : i32
    %c0_i32_1 = arith.constant 0 : i32
    %c0_i32_2 = arith.constant 0 : i32
    return %c0_i32, %c0_i32_0, %c0_i32_1 : i32, i32, i32
  }
  func.func @transform_3(%arg0: i32) -> (i32, i32, i32) {
    %c0_i32 = arith.constant 0 : i32
    %c0_i32_0 = arith.constant 0 : i32
    %c0_i32_1 = arith.constant 0 : i32
    %c0_i32_2 = arith.constant 0 : i32
    return %c0_i32, %c0_i32_0, %c0_i32_1 : i32, i32, i32
  }
  func.func @transform_4(%arg0: i32) -> (i32, i32, i32) {
    %c0_i32 = arith.constant 0 : i32
    %c0_i32_0 = arith.constant 0 : i32
    %c0_i32_1 = arith.constant 0 : i32
    %c0_i32_2 = arith.constant 0 : i32
    return %c0_i32, %c0_i32_0, %c0_i32_1 : i32, i32, i32
  }
  func.func @transform_5(%arg0: i32) -> (i32, i32, i32) {
    %c0_i32 = arith.constant 0 : i32
    %c0_i32_0 = arith.constant 0 : i32
    %c0_i32_1 = arith.constant 0 : i32
    %c0_i32_2 = arith.constant 0 : i32
    return %c0_i32, %c0_i32_0, %c0_i32_1 : i32, i32, i32
  }
  func.func @transform_6(%arg0: i32) -> (i32, i32, i32) {
    %c0_i32 = arith.constant 0 : i32
    %c0_i32_0 = arith.constant 0 : i32
    %c0_i32_1 = arith.constant 0 : i32
    %c0_i32_2 = arith.constant 0 : i32
    return %c0_i32, %c0_i32_0, %c0_i32_1 : i32, i32, i32
  }
  func.func @transform_7(%arg0: i32) -> (i32, i32, i32) {
    %c0_i32 = arith.constant 0 : i32
    %c0_i32_0 = arith.constant 0 : i32
    %c0_i32_1 = arith.constant 0 : i32
    %c0_i32_2 = arith.constant 0 : i32
    return %c0_i32, %c0_i32_0, %c0_i32_1 : i32, i32, i32
  }
  func.func @transform_8(%arg0: i32) -> (i32, i32, i32) {
    %c0_i32 = arith.constant 0 : i32
    %c0_i32_0 = arith.constant 0 : i32
    %c0_i32_1 = arith.constant 0 : i32
    %c0_i32_2 = arith.constant 0 : i32
    return %c0_i32, %c0_i32_0, %c0_i32_1 : i32, i32, i32
  }
  func.func @transform_9(%arg0: i32) -> (i32, i32) {
    %c0_i32 = arith.constant 0 : i32
    %c0_i32_0 = arith.constant 0 : i32
    %c0_i32_1 = arith.constant 0 : i32
    return %c0_i32, %c0_i32_0 : i32, i32
  }
  func.func @transform_10(%arg0: i32) -> (i32, i32) {
    %c0_i32 = arith.constant 0 : i32
    %c0_i32_0 = arith.constant 0 : i32
    %c0_i32_1 = arith.constant 0 : i32
    return %c0_i32, %c0_i32_0 : i32, i32
  }
  func.func @transform_11(%arg0: i32) -> (i32, i32, i32) {
    %c0_i32 = arith.constant 0 : i32
    %c0_i32_0 = arith.constant 0 : i32
    %c0_i32_1 = arith.constant 0 : i32
    return %arg0, %c0_i32, %c0_i32_0 : i32, i32, i32
  }
}

module attributes {stable_mosaic.version = 11 : i64} {
  func.func @tsmixer_fused_kernel(%arg0: i32, %arg1: memref<1x4x128xf32, #tpu.memory_space<vmem>>, %arg2: memref<2x128x32xf32, #tpu.memory_space<vmem>>, %arg3: memref<2x1x32xf32, #tpu.memory_space<vmem>>, %arg4: memref<2x32x128xf32, #tpu.memory_space<vmem>>, %arg5: memref<2x1x128xf32, #tpu.memory_space<vmem>>, %arg6: memref<2x4x32xf32, #tpu.memory_space<vmem>>, %arg7: memref<2x1x32xf32, #tpu.memory_space<vmem>>, %arg8: memref<2x32x4xf32, #tpu.memory_space<vmem>>, %arg9: memref<2x1x4xf32, #tpu.memory_space<vmem>>, %arg10: memref<4x2xf32, #tpu.memory_space<vmem>>, %arg11: memref<1x2xf32, #tpu.memory_space<vmem>>, %arg12: memref<1x2x128xf32, #tpu.memory_space<vmem>>) attributes {dimension_semantics = [#tpu.dimension_semantics<parallel>], iteration_bounds = array<i64: 2>, scalar_prefetch = 0 : i64, scratch_operands = 0 : i64, tpu.core_type = #tpu.core_type<tc>, window_params = [{transform_indices = @transform_0, window_bounds = array<i64: 1, 4, 128>}, {pipeline_mode = #tpu.pipeline_mode<synchronous>, transform_indices = @transform_1, window_bounds = array<i64: 2, 128, 32>}, {pipeline_mode = #tpu.pipeline_mode<synchronous>, transform_indices = @transform_2, window_bounds = array<i64: 2, 1, 32>}, {pipeline_mode = #tpu.pipeline_mode<synchronous>, transform_indices = @transform_3, window_bounds = array<i64: 2, 32, 128>}, {pipeline_mode = #tpu.pipeline_mode<synchronous>, transform_indices = @transform_4, window_bounds = array<i64: 2, 1, 128>}, {pipeline_mode = #tpu.pipeline_mode<synchronous>, transform_indices = @transform_5, window_bounds = array<i64: 2, 4, 32>}, {pipeline_mode = #tpu.pipeline_mode<synchronous>, transform_indices = @transform_6, window_bounds = array<i64: 2, 1, 32>}, {pipeline_mode = #tpu.pipeline_mode<synchronous>, transform_indices = @transform_7, window_bounds = array<i64: 2, 32, 4>}, {pipeline_mode = #tpu.pipeline_mode<synchronous>, transform_indices = @transform_8, window_bounds = array<i64: 2, 1, 4>}, {pipeline_mode = #tpu.pipeline_mode<synchronous>, transform_indices = @transform_9, window_bounds = array<i64: 4, 2>}, {pipeline_mode = #tpu.pipeline_mode<synchronous>, transform_indices = @transform_10, window_bounds = array<i64: 1, 2>}, {transform_indices = @transform_11, window_bounds = array<i64: 1, 2, 128>}]} {
    %c0 = arith.constant 0 : index
    %c0_0 = arith.constant 0 : index
    %c0_1 = arith.constant 0 : index
    %0 = vector.load %arg1[%c0, %c0_0, %c0_1] : memref<1x4x128xf32, #tpu.memory_space<vmem>>, vector<1x4x128xf32>
    %c0_2 = arith.constant 0 : index
    %c0_3 = arith.constant 0 : index
    %c0_4 = arith.constant 0 : index
    %1 = vector.load %arg2[%c0_2, %c0_3, %c0_4] : memref<2x128x32xf32, #tpu.memory_space<vmem>>, vector<1x128x32xf32>
    %2 = vector.shape_cast %1 : vector<1x128x32xf32> to vector<128x32xf32>
    %c0_5 = arith.constant 0 : index
    %c0_6 = arith.constant 0 : index
    %c0_7 = arith.constant 0 : index
    %3 = vector.load %arg3[%c0_5, %c0_6, %c0_7] : memref<2x1x32xf32, #tpu.memory_space<vmem>>, vector<1x1x32xf32>
    %4 = vector.shape_cast %3 : vector<1x1x32xf32> to vector<1x32xf32>
    %c0_8 = arith.constant 0 : index
    %c0_9 = arith.constant 0 : index
    %c0_10 = arith.constant 0 : index
    %5 = vector.load %arg4[%c0_8, %c0_9, %c0_10] : memref<2x32x128xf32, #tpu.memory_space<vmem>>, vector<1x32x128xf32>
    %6 = vector.shape_cast %5 : vector<1x32x128xf32> to vector<32x128xf32>
    %c0_11 = arith.constant 0 : index
    %c0_12 = arith.constant 0 : index
    %c0_13 = arith.constant 0 : index
    %7 = vector.load %arg5[%c0_11, %c0_12, %c0_13] : memref<2x1x128xf32, #tpu.memory_space<vmem>>, vector<1x1x128xf32>
    %8 = vector.shape_cast %7 : vector<1x1x128xf32> to vector<1x128xf32>
    %c0_14 = arith.constant 0 : index
    %c0_15 = arith.constant 0 : index
    %c0_16 = arith.constant 0 : index
    %9 = vector.load %arg6[%c0_14, %c0_15, %c0_16] : memref<2x4x32xf32, #tpu.memory_space<vmem>>, vector<1x4x32xf32>
    %10 = vector.shape_cast %9 : vector<1x4x32xf32> to vector<4x32xf32>
    %c0_17 = arith.constant 0 : index
    %c0_18 = arith.constant 0 : index
    %c0_19 = arith.constant 0 : index
    %11 = vector.load %arg7[%c0_17, %c0_18, %c0_19] : memref<2x1x32xf32, #tpu.memory_space<vmem>>, vector<1x1x32xf32>
    %12 = vector.shape_cast %11 : vector<1x1x32xf32> to vector<1x32xf32>
    %c0_20 = arith.constant 0 : index
    %c0_21 = arith.constant 0 : index
    %c0_22 = arith.constant 0 : index
    %13 = vector.load %arg8[%c0_20, %c0_21, %c0_22] : memref<2x32x4xf32, #tpu.memory_space<vmem>>, vector<1x32x4xf32>
    %14 = vector.shape_cast %13 : vector<1x32x4xf32> to vector<32x4xf32>
    %c0_23 = arith.constant 0 : index
    %c0_24 = arith.constant 0 : index
    %c0_25 = arith.constant 0 : index
    %15 = vector.load %arg9[%c0_23, %c0_24, %c0_25] : memref<2x1x4xf32, #tpu.memory_space<vmem>>, vector<1x1x4xf32>
    %16 = vector.shape_cast %15 : vector<1x1x4xf32> to vector<1x4xf32>
    %17 = vector.shape_cast %0 : vector<1x4x128xf32> to vector<4x128xf32>
    %cst = arith.constant dense<0.000000e+00> : vector<4x32xf32>
    %18 = tpu.matmul %17, %2, %cst {dimension_numbers = #tpu.dot_dimension_numbers<[1], [0], [0], [1], [0, 0, 1, 1], [], []>} : vector<4x128xf32>, vector<128x32xf32>, vector<4x32xf32> -> vector<4x32xf32>
    %19 = vector.broadcast %4 : vector<1x32xf32> to vector<4x32xf32>
    %20 = arith.addf %18, %19 : vector<4x32xf32>
    %cst_26 = arith.constant 0.000000e+00 : f32
    %21 = vector.broadcast %cst_26 : f32 to vector<4x32xf32>
    %22 = arith.maximumf %20, %21 : vector<4x32xf32>
    %cst_27 = arith.constant dense<0.000000e+00> : vector<4x128xf32>
    %23 = tpu.matmul %22, %6, %cst_27 {dimension_numbers = #tpu.dot_dimension_numbers<[1], [0], [0], [1], [0, 0, 1, 1], [], []>} : vector<4x32xf32>, vector<32x128xf32>, vector<4x128xf32> -> vector<4x128xf32>
    %24 = vector.broadcast %8 : vector<1x128xf32> to vector<4x128xf32>
    %25 = arith.addf %23, %24 : vector<4x128xf32>
    %26 = vector.shape_cast %25 : vector<4x128xf32> to vector<1x4x128xf32>
    %27 = arith.addf %0, %26 : vector<1x4x128xf32>
    %28 = tpu.transpose %27, [0, 2, 1] : vector<1x4x128xf32> -> vector<1x128x4xf32>
    %29 = vector.shape_cast %28 : vector<1x128x4xf32> to vector<128x4xf32>
    %cst_28 = arith.constant dense<0.000000e+00> : vector<128x32xf32>
    %30 = tpu.matmul %29, %10, %cst_28 {dimension_numbers = #tpu.dot_dimension_numbers<[1], [0], [0], [1], [0, 0, 1, 1], [], []>} : vector<128x4xf32>, vector<4x32xf32>, vector<128x32xf32> -> vector<128x32xf32>
    %31 = vector.broadcast %12 : vector<1x32xf32> to vector<128x32xf32>
    %32 = arith.addf %30, %31 : vector<128x32xf32>
    %cst_29 = arith.constant 0.000000e+00 : f32
    %33 = vector.broadcast %cst_29 : f32 to vector<128x32xf32>
    %34 = arith.maximumf %32, %33 : vector<128x32xf32>
    %cst_30 = arith.constant dense<0.000000e+00> : vector<128x4xf32>
    %35 = tpu.matmul %34, %14, %cst_30 {dimension_numbers = #tpu.dot_dimension_numbers<[1], [0], [0], [1], [0, 0, 1, 1], [], []>} : vector<128x32xf32>, vector<32x4xf32>, vector<128x4xf32> -> vector<128x4xf32>
    %36 = vector.broadcast %16 : vector<1x4xf32> to vector<128x4xf32>
    %37 = arith.addf %35, %36 : vector<128x4xf32>
    %38 = arith.addf %29, %37 : vector<128x4xf32>
    %39 = vector.shape_cast %38 : vector<128x4xf32> to vector<1x128x4xf32>
    %40 = tpu.transpose %39, [0, 2, 1] : vector<1x128x4xf32> -> vector<1x4x128xf32>
    %c1 = arith.constant 1 : index
    %c0_31 = arith.constant 0 : index
    %c0_32 = arith.constant 0 : index
    %41 = vector.load %arg2[%c1, %c0_31, %c0_32] : memref<2x128x32xf32, #tpu.memory_space<vmem>>, vector<1x128x32xf32>
    %42 = vector.shape_cast %41 : vector<1x128x32xf32> to vector<128x32xf32>
    %c1_33 = arith.constant 1 : index
    %c0_34 = arith.constant 0 : index
    %c0_35 = arith.constant 0 : index
    %43 = vector.load %arg3[%c1_33, %c0_34, %c0_35] : memref<2x1x32xf32, #tpu.memory_space<vmem>>, vector<1x1x32xf32>
    %44 = vector.shape_cast %43 : vector<1x1x32xf32> to vector<1x32xf32>
    %c1_36 = arith.constant 1 : index
    %c0_37 = arith.constant 0 : index
    %c0_38 = arith.constant 0 : index
    %45 = vector.load %arg4[%c1_36, %c0_37, %c0_38] : memref<2x32x128xf32, #tpu.memory_space<vmem>>, vector<1x32x128xf32>
    %46 = vector.shape_cast %45 : vector<1x32x128xf32> to vector<32x128xf32>
    %c1_39 = arith.constant 1 : index
    %c0_40 = arith.constant 0 : index
    %c0_41 = arith.constant 0 : index
    %47 = vector.load %arg5[%c1_39, %c0_40, %c0_41] : memref<2x1x128xf32, #tpu.memory_space<vmem>>, vector<1x1x128xf32>
    %48 = vector.shape_cast %47 : vector<1x1x128xf32> to vector<1x128xf32>
    %c1_42 = arith.constant 1 : index
    %c0_43 = arith.constant 0 : index
    %c0_44 = arith.constant 0 : index
    %49 = vector.load %arg6[%c1_42, %c0_43, %c0_44] : memref<2x4x32xf32, #tpu.memory_space<vmem>>, vector<1x4x32xf32>
    %50 = vector.shape_cast %49 : vector<1x4x32xf32> to vector<4x32xf32>
    %c1_45 = arith.constant 1 : index
    %c0_46 = arith.constant 0 : index
    %c0_47 = arith.constant 0 : index
    %51 = vector.load %arg7[%c1_45, %c0_46, %c0_47] : memref<2x1x32xf32, #tpu.memory_space<vmem>>, vector<1x1x32xf32>
    %52 = vector.shape_cast %51 : vector<1x1x32xf32> to vector<1x32xf32>
    %c1_48 = arith.constant 1 : index
    %c0_49 = arith.constant 0 : index
    %c0_50 = arith.constant 0 : index
    %53 = vector.load %arg8[%c1_48, %c0_49, %c0_50] : memref<2x32x4xf32, #tpu.memory_space<vmem>>, vector<1x32x4xf32>
    %54 = vector.shape_cast %53 : vector<1x32x4xf32> to vector<32x4xf32>
    %c1_51 = arith.constant 1 : index
    %c0_52 = arith.constant 0 : index
    %c0_53 = arith.constant 0 : index
    %55 = vector.load %arg9[%c1_51, %c0_52, %c0_53] : memref<2x1x4xf32, #tpu.memory_space<vmem>>, vector<1x1x4xf32>
    %56 = vector.shape_cast %55 : vector<1x1x4xf32> to vector<1x4xf32>
    %57 = vector.shape_cast %40 : vector<1x4x128xf32> to vector<4x128xf32>
    %cst_54 = arith.constant dense<0.000000e+00> : vector<4x32xf32>
    %58 = tpu.matmul %57, %42, %cst_54 {dimension_numbers = #tpu.dot_dimension_numbers<[1], [0], [0], [1], [0, 0, 1, 1], [], []>} : vector<4x128xf32>, vector<128x32xf32>, vector<4x32xf32> -> vector<4x32xf32>
    %59 = vector.broadcast %44 : vector<1x32xf32> to vector<4x32xf32>
    %60 = arith.addf %58, %59 : vector<4x32xf32>
    %cst_55 = arith.constant 0.000000e+00 : f32
    %61 = vector.broadcast %cst_55 : f32 to vector<4x32xf32>
    %62 = arith.maximumf %60, %61 : vector<4x32xf32>
    %cst_56 = arith.constant dense<0.000000e+00> : vector<4x128xf32>
    %63 = tpu.matmul %62, %46, %cst_56 {dimension_numbers = #tpu.dot_dimension_numbers<[1], [0], [0], [1], [0, 0, 1, 1], [], []>} : vector<4x32xf32>, vector<32x128xf32>, vector<4x128xf32> -> vector<4x128xf32>
    %64 = vector.broadcast %48 : vector<1x128xf32> to vector<4x128xf32>
    %65 = arith.addf %63, %64 : vector<4x128xf32>
    %66 = vector.shape_cast %65 : vector<4x128xf32> to vector<1x4x128xf32>
    %67 = arith.addf %40, %66 : vector<1x4x128xf32>
    %68 = tpu.transpose %67, [0, 2, 1] : vector<1x4x128xf32> -> vector<1x128x4xf32>
    %69 = vector.shape_cast %68 : vector<1x128x4xf32> to vector<128x4xf32>
    %cst_57 = arith.constant dense<0.000000e+00> : vector<128x32xf32>
    %70 = tpu.matmul %69, %50, %cst_57 {dimension_numbers = #tpu.dot_dimension_numbers<[1], [0], [0], [1], [0, 0, 1, 1], [], []>} : vector<128x4xf32>, vector<4x32xf32>, vector<128x32xf32> -> vector<128x32xf32>
    %71 = vector.broadcast %52 : vector<1x32xf32> to vector<128x32xf32>
    %72 = arith.addf %70, %71 : vector<128x32xf32>
    %cst_58 = arith.constant 0.000000e+00 : f32
    %73 = vector.broadcast %cst_58 : f32 to vector<128x32xf32>
    %74 = arith.maximumf %72, %73 : vector<128x32xf32>
    %cst_59 = arith.constant dense<0.000000e+00> : vector<128x4xf32>
    %75 = tpu.matmul %74, %54, %cst_59 {dimension_numbers = #tpu.dot_dimension_numbers<[1], [0], [0], [1], [0, 0, 1, 1], [], []>} : vector<128x32xf32>, vector<32x4xf32>, vector<128x4xf32> -> vector<128x4xf32>
    %76 = vector.broadcast %56 : vector<1x4xf32> to vector<128x4xf32>
    %77 = arith.addf %75, %76 : vector<128x4xf32>
    %78 = arith.addf %69, %77 : vector<128x4xf32>
    %c0_60 = arith.constant 0 : index
    %c0_61 = arith.constant 0 : index
    %79 = vector.load %arg10[%c0_60, %c0_61] : memref<4x2xf32, #tpu.memory_space<vmem>>, vector<4x2xf32>
    %cst_62 = arith.constant dense<0.000000e+00> : vector<128x2xf32>
    %80 = tpu.matmul %78, %79, %cst_62 {dimension_numbers = #tpu.dot_dimension_numbers<[1], [0], [0], [1], [0, 0, 1, 1], [], []>} : vector<128x4xf32>, vector<4x2xf32>, vector<128x2xf32> -> vector<128x2xf32>
    %c0_63 = arith.constant 0 : index
    %c0_64 = arith.constant 0 : index
    %81 = vector.load %arg11[%c0_63, %c0_64] : memref<1x2xf32, #tpu.memory_space<vmem>>, vector<1x2xf32>
    %82 = vector.broadcast %81 : vector<1x2xf32> to vector<128x2xf32>
    %83 = arith.addf %80, %82 : vector<128x2xf32>
    %84 = vector.shape_cast %83 : vector<128x2xf32> to vector<1x128x2xf32>
    %85 = tpu.transpose %84, [0, 2, 1] : vector<1x128x2xf32> -> vector<1x2x128xf32>
    %c0_65 = arith.constant 0 : index
    %c0_66 = arith.constant 0 : index
    %c0_67 = arith.constant 0 : index
    %86 = vector.load %arg12[%c0_65, %c0_66, %c0_67] : memref<1x2x128xf32, #tpu.memory_space<vmem>>, vector<1x2x128xf32>
    tpu.vector_store %arg12[%c0_65, %c0_66, %c0_67], %85 {strides = array<i32>} : memref<1x2x128xf32, #tpu.memory_space<vmem>>, vector<1x2x128xf32>,
    return
  }
  func.func @transform_0(%arg0: i32) -> (i32, i32, i32) {
    %c0_i32 = arith.constant 0 : i32
    %c0_i32_0 = arith.constant 0 : i32
    %c0_i32_1 = arith.constant 0 : i32
    return %arg0, %c0_i32, %c0_i32_0 : i32, i32, i32
  }
  func.func @transform_1(%arg0: i32) -> (i32, i32, i32) {
    %c0_i32 = arith.constant 0 : i32
    %c0_i32_0 = arith.constant 0 : i32
    %c0_i32_1 = arith.constant 0 : i32
    %c0_i32_2 = arith.constant 0 : i32
    return %c0_i32, %c0_i32_0, %c0_i32_1 : i32, i32, i32
  }
  func.func @transform_2(%arg0: i32) -> (i32, i32, i32) {
    %c0_i32 = arith.constant 0 : i32
    %c0_i32_0 = arith.constant 0 : i32
    %c0_i32_1 = arith.constant 0 : i32
    %c0_i32_2 = arith.constant 0 : i32
    return %c0_i32, %c0_i32_0, %c0_i32_1 : i32, i32, i32
  }
  func.func @transform_3(%arg0: i32) -> (i32, i32, i32) {
    %c0_i32 = arith.constant 0 : i32
    %c0_i32_0 = arith.constant 0 : i32
    %c0_i32_1 = arith.constant 0 : i32
    %c0_i32_2 = arith.constant 0 : i32
    return %c0_i32, %c0_i32_0, %c0_i32_1 : i32, i32, i32
  }
  func.func @transform_4(%arg0: i32) -> (i32, i32, i32) {
    %c0_i32 = arith.constant 0 : i32
    %c0_i32_0 = arith.constant 0 : i32
    %c0_i32_1 = arith.constant 0 : i32
    %c0_i32_2 = arith.constant 0 : i32
    return %c0_i32, %c0_i32_0, %c0_i32_1 : i32, i32, i32
  }
  func.func @transform_5(%arg0: i32) -> (i32, i32, i32) {
    %c0_i32 = arith.constant 0 : i32
    %c0_i32_0 = arith.constant 0 : i32
    %c0_i32_1 = arith.constant 0 : i32
    %c0_i32_2 = arith.constant 0 : i32
    return %c0_i32, %c0_i32_0, %c0_i32_1 : i32, i32, i32
  }
  func.func @transform_6(%arg0: i32) -> (i32, i32, i32) {
    %c0_i32 = arith.constant 0 : i32
    %c0_i32_0 = arith.constant 0 : i32
    %c0_i32_1 = arith.constant 0 : i32
    %c0_i32_2 = arith.constant 0 : i32
    return %c0_i32, %c0_i32_0, %c0_i32_1 : i32, i32, i32
  }
  func.func @transform_7(%arg0: i32) -> (i32, i32, i32) {
    %c0_i32 = arith.constant 0 : i32
    %c0_i32_0 = arith.constant 0 : i32
    %c0_i32_1 = arith.constant 0 : i32
    %c0_i32_2 = arith.constant 0 : i32
    return %c0_i32, %c0_i32_0, %c0_i32_1 : i32, i32, i32
  }
  func.func @transform_8(%arg0: i32) -> (i32, i32, i32) {
    %c0_i32 = arith.constant 0 : i32
    %c0_i32_0 = arith.constant 0 : i32
    %c0_i32_1 = arith.constant 0 : i32
    %c0_i32_2 = arith.constant 0 : i32
    return %c0_i32, %c0_i32_0, %c0_i32_1 : i32, i32, i32
  }
  func.func @transform_9(%arg0: i32) -> (i32, i32) {
    %c0_i32 = arith.constant 0 : i32
    %c0_i32_0 = arith.constant 0 : i32
    %c0_i32_1 = arith.constant 0 : i32
    return %c0_i32, %c0_i32_0 : i32, i32
  }
  func.func @transform_10(%arg0: i32) -> (i32, i32) {
    %c0_i32 = arith.constant 0 : i32
    %c0_i32_0 = arith.constant 0 : i32
    %c0_i32_1 = arith.constant 0 : i32
    return %c0_i32, %c0_i32_0 : i32, i32
  }
  func.func @transform_11(%arg0: i32) -> (i32, i32, i32) {
    %c0_i32 = arith.constant 0 : i32
    %c0_i32_0 = arith.constant 0 : i32
    %c0_i32_1 = arith.constant 0 : i32
    return %arg0, %c0_i32, %c0_i32_0 : i32, i32, i32
  }
}

</mosaic_0001>

<bundles_post_ra>
// kernel: tpu_custom_call.1
= control target key start
LH: loop header
LB: loop body
LE: loop exit
PB: predicated region body
PF: predicated region fallthrough
CT: control target
= control target key end

     0   :  { %s3243_s0 = inlined_call_operand.vmem [shape: f32[2,4,128], index: 0, kind: input, shape index: {}]   ;;  %s3244_s1 = inlined_call_operand.vmem [shape: f32[2,128,32], index: 1, kind: input, shape index: {}]   ;;  %s3245_s2 = inlined_call_operand.vmem [shape: f32[2,1,32], index: 2, kind: input, shape index: {}]   ;;  %s3246_s3 = inlined_call_operand.vmem [shape: f32[2,32,128], index: 3, kind: input, shape index: {}]   ;;  %s3247_s4 = inlined_call_operand.vmem [shape: f32[2,1,128], index: 4, kind: input, shape index: {}]   ;;  %s3248_s5 = inlined_call_operand.vmem [shape: f32[2,4,32], index: 5, kind: input, shape index: {}]   ;;  %s3249_s6 = inlined_call_operand.vmem [shape: f32[2,1,32], index: 6, kind: input, shape index: {}]   ;;  %s3250_s7 = inlined_call_operand.vmem [shape: f32[2,32,4], index: 7, kind: input, shape index: {}]   ;;  %s3251_s8 = inlined_call_operand.vmem [shape: f32[2,1,4], index: 8, kind: input, shape index: {}]   ;;  %s3252_s9 = inlined_call_operand.vmem [shape: f32[4,2], index: 9, kind: input, shape index: {}]   ;;  %s3253_s10 = inlined_call_operand.vmem [shape: f32[1,2], index: 10, kind: input, shape index: {}]   ;;  %s3254_s11 = inlined_call_operand.hbm [shape: f32[2,2,128], index: 11, kind: output, shape index: {}]  }
   0x1   :  { %3255 = sst [smem:[#allocation5_spill]] %s3243_s0 }
   0x2   :  { %3256 = sst [smem:[#allocation6_spill]] %s3244_s1 }
   0x3   :  { %16 = vsyncpa [#allocation3], 0 }
   0x4   :  { %18 = vsyncpa [#allocation3 + $0x1], 0  ;;  %s2706_s17 = smov 0   ;;  %s2708_s18 = smov 0  }
   0x5   :  { %s2710_s19 = smov 0   ;;  %s2712_s20 = smov 0  }
   0x6 LB: > { %s2727_s21 = sadd.s32 4294967295, %s2641_s20   ;;  %s2038_s22 = sadd.s32 4294967294, %s2641_s20   ;;  %s2641_s20 = sphi %s2712_s20, %s3264_s20   ;;  %s2637_s19 = sphi %s2710_s19, %s3263_s19   ;;  %s2633_s18 = sphi %s2708_s18, %s3262_s18   ;;  %s2629_s17 = sphi %s2706_s17, %s3261_s17  }
   0x7   : > { %s2731_s23 = sadd.s32 1, %s2641_s20   ;;  %s267_s24 = sadd.s32 1, %s2637_s19 }
   0x8   : > { %s264_s25 = ssub.s32 %s2641_s20, %s2731_s23  ;;  %p277_p0 = scmp.ne.s32.totalorder %s2637_s19, %s2633_s18 }
   0x9   : > { %p265_p1 = scmp.eq.s32.totalorder %s264_s25, 0  ;;  %p278_p2 = scmp.eq.s32.totalorder %s2727_s21, 1 }
   0xa   : > { %p283_p3 = scmp.ne.s32.totalorder %s2633_s18, %s2629_s17  ;;  %p284_p4 = scmp.eq.s32.totalorder %s2038_s22, 1 }
   0xb   : > { %s2742_s26 = scalar_select %p265_p1, %s2637_s19, %s267_s24  }
   0xc   : > { %p2744_p5 = por %p278_p2, %p277_p0  ;;  %p2748_p6 = por %p284_p4, %p283_p3 }
   0xd   : > { %p2041_p7 = scmp.ge.s32.totalorder %s2641_s20, 1  ;;  %p339_p8 = scmp.lt.s32.totalorder %s2641_s20, 3 }
   0xf   : > { %p340_p9 = pnand %p2041_p7, %p339_p8 }
  0x10   : > { %s3259_s1 = sld [smem:[#allocation6_spill]] (!%p340_p9)  ;;  %p378_p10 = scmp.lt.s32.totalorder (!%p340_p9), %s2727_s21, 1 }
  0x11   : > { %343 = sbr.rel (%p340_p9) target bundleno = 2360 (0x938), region = 64  ;;  %s3260_s0 = sld [smem:[#allocation5_spill]] (!%p340_p9) }
  0x16   : > { %v398_v0 = vld [vmem:[%s3259_s1 + $0x78] sm:$0xff]  ;;  %v2643_v1 = vmov 0.0   ;;  %v397_v2 = vld [vmem:[%s3259_s1 + $0x70] sm:$0xff]  ;;  %vm2644_vm0 = vmmov 0   ;;  %v396_v3 = vld [vmem:[%s3259_s1 + $0x68] sm:$0xff]  ;;  %s379_s12 = scalar_select %p378_p10, %s2727_s21, 1 }
  0x17   : > { %2306 = vmatprep.subr.mxu0 %v2643_v1  ;;  %2338 = vmatprep.mubr.msk.f32.mxu0 %vm2644_vm0, %v2643_v1  ;;  %v395_v4 = vld [vmem:[%s3259_s1 + $0x60] sm:$0xff]  ;;  %v394_v5 = vld [vmem:[%s3259_s1 + $0x58] sm:$0xff]  ;;  %v393_v6 = vld [vmem:[%s3259_s1 + $0x50] sm:$0xff]  ;;  %vm495_vm1 = vcmask 261120   ;;  %vm657_vm2 = vcmask 1043456   ;;  %vm608_vm3 = vcmask 31744  }
  0x18   : > { %2307 = vmatpush3.msra.mxu0 %v398_v0  ;;  %v392_v7 = vld [vmem:[%s3259_s1 + $0x48] sm:$0xff]  ;;  %v391_v8 = vld [vmem:[%s3259_s1 + $0x40] sm:$0xff]  ;;  %v390_v9 = vld [vmem:[%s3259_s1 + $0x38] sm:$0xff]  ;;  %s2043_s22 = sshll.u32 %s379_s12, 2  ;;  %s375_s12 = sand.u32 1, %s2633_s18  }
  0x19   : > { %2308 = vmatprep.subr.mxu0 %v2643_v1  ;;  %v389_v10 = vld [vmem:[%s3259_s1 + $0x30] sm:$0xff]  ;;  %v388_v11 = vld [vmem:[%s3259_s1 + $0x28] sm:$0xff]  ;;  %v387_v12 = vld [vmem:[%s3259_s1 + $0x20] sm:$0xff]  ;;  %s381_s15 = scalar_lea.vmem %s3260_s0, %s2043_s22  ;;  %s2042_s16 = sshll.u32 %s375_s12, 1 }
  0x1a   : > { %2309 = vmatpush3.msra.mxu0 %v397_v2  ;;  %v386_v13 = vld [vmem:[%s3259_s1 + $0x18] sm:$0xff]  ;;  %v385_v14 = vld [vmem:[%s3259_s1 + $0x10] sm:$0xff]  ;;  %v384_v15 = vld [vmem:[%s3259_s1 + $0x8] sm:$0xff]  ;;  %s377_s24 = scalar_lea.vmem [#allocation2], %s2042_s16  ;;  %s2168_s22 = sshll.u32 %s2727_s21, 5 }
  0x1b   : > { %2310 = vmatprep.subr.mxu0 %v2643_v1  ;;  %v383_v16 = vld [vmem:[%s3259_s1] sm:$0xff]  ;;  %v403_v18 = vld [vmem:[%s3246_s3 + $0x18] sm:$0xff]  ;;  %v402_v19 = vld [vmem:[%s3246_s3 + $0x10] sm:$0xff]  ;;  %s1979_s25 = sshll.u32 %s377_s24, 4  ;;  %s1977_s13 = scalar_lea.hbm %s3254_s11, %s2168_s22  ;;  %s3205_s25 = int_to_ptr.vmem [resolvable:$true] %s1979_s25 }
  0x1c   : > { %2311 = vmatpush3.msra.mxu0 %v396_v3  ;;  %v382_v17 = vld [vmem:[%s381_s15] sm:$0xf]  ;;  %v401_v20 = vld [vmem:[%s3246_s3 + $0x8] sm:$0xff]  ;;  %v410_v49 = vld [vmem:[%s3250_s7 + $0x18] sm:$0xff]  ;;  %s1966_s14 = scalar_lea.sflag [#allocation3], %s375_s12  ;;  %s2581_s15 = scalar_lea.vmem %s3205_s25, 32 }
  0x1d   : > { %2312 = vmatprep.subr.mxu0 %v2643_v1  ;;  %v400_v21 = vld [vmem:[%s3246_s3] sm:$0xff]  ;;  %v409_v50 = vld [vmem:[%s3250_s7 + $0x10] sm:$0xff]  ;;  %v408_v51 = vld [vmem:[%s3250_s7 + $0x8] sm:$0xff]  ;;  %p2582_p11 = scmp.ne.s32.totalorder %s3205_s25, %s2581_s15  ;;  %s2645_s16 = smov [#allocation2]  }
  0x1e   : > { %2313 = vmatpush3.msra.mxu0 %v395_v4  ;;  %v2044_v22 = vld [vmem:[%s3245_s2] ss:$0 sm:$0xff]  ;;  %s2585_s0 = sshll.u32 %s2645_s16, 4  ;;  %s2586_s0 = int_to_ptr.vmem [resolvable:$false] %s2585_s0 }
  0x1f   : > { %2314 = vmatprep.subr.mxu0 %v2643_v1  ;;  %v2045_v27 = vld [vmem:[%s3247_s4] ss:$0 sm:$0xff]  ;;  %p2583_p12 = pnand %p2582_p11, %p2744_p5  ;;  %s2587_s21 = scalar_lea.vmem %s2586_s0, 64 }
  0x20   : > { %2315 = vmatpush3.msra.mxu0 %v394_v5  ;;  %v405_v31 = vld [vmem:[%s3248_s5] sm:$0xf]  ;;  %p2588_p0 = scmp.lt.s32.totalorder %s3205_s25, %s2586_s0  ;;  %p2589_p1 = scmp.lt.s32.totalorder %s2587_s21, %s2581_s15 }
  0x21   : > { %2316 = vmatprep.subr.mxu0 %v2643_v1  ;;  %2352 = vmatprep.subr.msk.mxu1 %vm657_vm2, %v405_v31  ;;  %v407_v52 = vld [vmem:[%s3250_s7] sm:$0xff]  ;;  %p2584_p13 = pneg %p2583_p12 }
  0x22   : > { %2317 = vmatpush3.msra.mxu0 %v393_v6  ;;  %2353 = vmatpush3.msk.msra.mxu1 %vm657_vm2, %v405_v31  ;;  %v2047_v53 = vld [vmem:[%s3249_s6] ss:$0 sm:$0xff]  ;;  %p2590_p2 = por %p2589_p1, %p2588_p0 }
  0x23   : > { %2318 = vmatprep.subr.mxu0 %v2643_v1  ;;  %2410 = vmatprep.subr.mxu1 %v2643_v1 }
  0x24   : > { %2319 = vmatpush3.msra.mxu0 %v392_v7  ;;  %p2591_p3 = pnand %p2590_p2, %p2584_p13 }
  0x25   : > { %2320 = vmatprep.subr.mxu0 %v2643_v1 }
  0x26   : > { %2321 = vmatpush3.msra.mxu0 %v391_v8 }
  0x27   : > { %2322 = vmatprep.subr.mxu0 %v2643_v1 }
  0x28   : > { %2323 = vmatpush3.msra.mxu0 %v390_v9 }
  0x29   : > { %2324 = vmatprep.subr.mxu0 %v2643_v1 }
  0x2a   : > { %2325 = vmatpush3.msra.mxu0 %v389_v10 }
  0x2b   : > { %2326 = vmatprep.subr.mxu0 %v2643_v1 }
  0x2c   : > { %2327 = vmatpush3.msra.mxu0 %v388_v11 }
  0x2d   : > { %2328 = vmatprep.subr.mxu0 %v2643_v1 }
  0x2e   : > { %2329 = vmatpush3.msra.mxu0 %v387_v12 }
  0x2f   : > { %2330 = vmatprep.subr.mxu0 %v2643_v1 }
  0x30   : > { %2331 = vmatpush3.msra.mxu0 %v386_v13 }
  0x31   : > { %2332 = vmatprep.subr.mxu0 %v2643_v1 }
  0x32   : > { %2333 = vmatpush3.msra.mxu0 %v385_v14 }
  0x33   : > { %2334 = vmatprep.subr.mxu0 %v2643_v1 }
  0x34   : > { %2335 = vmatpush3.msra.mxu0 %v384_v15 }
  0x35   : > { %2336 = vmatprep.subr.mxu0 %v2643_v1 }
  0x36   : > { %2337 = vmatpush3.msra.mxu0 %v383_v16 }
  0x37   : > { %2339 = vmatmul.mubr.f32.vlgmr.msra.gmra.mxu0 %v382_v17  ;;  %2341 = vmatprep.subr.mxu0 %v2643_v1 }
  0x38   : > { %2342 = vmatpush3.msra.mxu0 %v403_v18  ;;  %2349 = vmatprep.mubr.msk.f32.mxu0 %vm2644_vm0, %v2643_v1 }
  0x39   : > { %2343 = vmatprep.subr.mxu0 %v2643_v1 }
  0x3a   : > { %2344 = vmatpush3.msra.mxu0 %v402_v19 }
  0x3b   : > { %2345 = vmatprep.subr.mxu0 %v2643_v1 }
  0x3c   : > { %2346 = vmatpush3.msra.mxu0 %v401_v20 }
  0x3d   : > { %2347 = vmatprep.subr.mxu0 %v2643_v1 }
  0x3e   : > { %2348 = vmatpush3.msra.mxu0 %v400_v21 }
  0x3f   : > { %2378 = vmatprep.subr.mxu0 %v410_v49 }
  0xf7   : > { %v484_v23 = vpop.f32.mrf.mxu0 }
  0xf8   : > { %v485_v24 = vadd.f32 %v2044_v22, %v484_v23 }
  0xf9   : > { %v2340_v25 = vpop.f32.mrf.mxu0 }
  0xfa   : > { %v488_v26 = vmax.f32 %v485_v24, 0.0 }
  0xfc   : > { %2350 = vmatmul.mubr.msk.f32.vlgmr.msra.gmra.mxu0 %vm495_vm1, %v488_v26 }
  0xfd   : > { %2379 = vmatpush3.msra.mxu0 %v410_v49 }
  0xfe   : > { %2380 = vmatprep.subr.mxu0 %v409_v50 }
  0xff   : > { %2381 = vmatpush3.msra.mxu0 %v409_v50 }
 0x100   : > { %2382 = vmatprep.subr.mxu0 %v408_v51 }
 0x101   : > { %2383 = vmatpush3.msra.mxu0 %v408_v51 }
 0x102   : > { %2384 = vmatprep.subr.mxu0 %v407_v52 }
 0x103   : > { %2385 = vmatpush3.msra.mxu0 %v407_v52 }
 0x1bc   : > { %v565_v28 = vpop.f32.mrf.mxu0 }
 0x1bd   : > { %v566_v29 = vadd.f32 %v2045_v27, %v565_v28 }
 0x1be   : > { %v2351_v30 = vpop.f32.mrf.mxu0 }
 0x1bf   : > { %v569_v32 = vadd.f32 %v566_v29, %v382_v17 }
 0x1c1   : > { %570 = vxpose.xlu0.b32.start.end [1/1] (short) %v569_v32, 128 }
 0x23d   : > { %v2856_v33 = vpop.trf.xlu0 }
 0x23e   : > { %2354 = vmatprep.mubr.msk.f32.mxu1 %vm608_vm3, %v2856_v33 }
 0x241   : > { %v2860_v34 = vpop.trf.xlu0 }
 0x242   : > { %2355 = vmatmul.mubr.msk.f32.vlgmr.msra.gmra.mxu1 %vm608_vm3, %v2860_v34 }
 0x245   : > { %v2864_v35 = vpop.trf.xlu0 }
 0x246   : > { %2357 = vmatprep.mubr.msk.f32.mxu1 %vm608_vm3, %v2864_v35 }
 0x249   : > { %v2868_v36 = vpop.trf.xlu0 }
 0x24a   : > { %2358 = vmatmul.mubr.msk.f32.gmra.mxu1 %vm608_vm3, %v2868_v36 }
 0x24d   : > { %v2872_v37 = vpop.trf.xlu0 }
 0x24e   : > { %2360 = vmatprep.mubr.msk.f32.mxu1 %vm608_vm3, %v2872_v37 }
 0x251   : > { %v2876_v38 = vpop.trf.xlu0 }
 0x252   : > { %2361 = vmatmul.mubr.msk.f32.gmra.mxu1 %vm608_vm3, %v2876_v38 }
 0x255   : > { %v2880_v39 = vpop.trf.xlu0 }
 0x256   : > { %2363 = vmatprep.mubr.msk.f32.mxu1 %vm608_vm3, %v2880_v39 }
 0x259   : > { %v2884_v40 = vpop.trf.xlu0 }
 0x25a   : > { %2364 = vmatmul.mubr.msk.f32.gmra.mxu1 %vm608_vm3, %v2884_v40 }
 0x25d   : > { %v2888_v41 = vpop.trf.xlu0 }
 0x25e   : > { %2366 = vmatprep.mubr.msk.f32.mxu1 %vm608_vm3, %v2888_v41 }
 0x261   : > { %v2892_v42 = vpop.trf.xlu0 }
 0x262   : > { %2367 = vmatmul.mubr.msk.f32.gmra.mxu1 %vm608_vm3, %v2892_v42 }
 0x265   : > { %v2896_v43 = vpop.trf.xlu0 }
 0x266   : > { %2369 = vmatprep.mubr.msk.f32.mxu1 %vm608_vm3, %v2896_v43 }
 0x269   : > { %v2900_v44 = vpop.trf.xlu0 }
 0x26a   : > { %2370 = vmatmul.mubr.msk.f32.gmra.mxu1 %vm608_vm3, %v2900_v44 }
 0x26d   : > { %v2904_v45 = vpop.trf.xlu0 }
 0x26e   : > { %2372 = vmatprep.mubr.msk.f32.mxu1 %vm608_vm3, %v2904_v45 }
 0x271   : > { %v2908_v46 = vpop.trf.xlu0 }
 0x272   : > { %2373 = vmatmul.mubr.msk.f32.gmra.mxu1 %vm608_vm3, %v2908_v46 }
 0x275   : > { %v2912_v47 = vpop.trf.xlu0 }
 0x276   : > { %2375 = vmatprep.mubr.msk.f32.mxu1 %vm608_vm3, %v2912_v47 }
 0x279   : > { %v2916_v48 = vpop.trf.xlu0 }
 0x27a   : > { %2376 = vmatmul.mubr.msk.f32.gmra.mxu1 %vm608_vm3, %v2916_v48 }
 0x27b   : > { %2442 = vmatprep.mubr.msk.f32.mxu1 %vm2644_vm0, %v2643_v1 }
 0x302   : > { %v2356_v54 = vpop.f32.mrf.mxu1 }
 0x303   : > { %v733_v55 = vadd.f32 %v2356_v54, %v2047_v53 }
 0x304   : > { %v727_v56 = vpop.f32.mrf.mxu1 }
 0x305   : > { %v728_v57 = vadd.f32 %v2047_v53, %v727_v56  ;;  %v807_v59 = vmax.f32 %v733_v55, 0.0  ;;  %v2097_v56 = vld [vmem:[%s3259_s1 + $0xf8] sm:$0xff] }
 0x306   : > { %2411 = vmatpush3.msra.mxu1 %v2097_v56 }
 0x307   : > { %v806_v58 = vmax.f32 %v728_v57, 0.0  ;;  %v2096_v57 = vld [vmem:[%s3259_s1 + $0xf0] sm:$0xff]  ;;  %2412 = vmatprep.subr.mxu1 %v2643_v1 }
 0x308   : > { %2413 = vmatpush3.msra.mxu1 %v2096_v57 }
 0x309   : > { %2386 = vmatprep.mubr.msk.f32.mxu0 %vm495_vm1, %v806_v58  ;;  %2414 = vmatprep.subr.mxu1 %v2643_v1  ;;  %v2094_v58 = vld [vmem:[%s3259_s1 + $0xe0] sm:$0xff] }
 0x30a   : > { %v2359_v60 = vpop.f32.mrf.mxu1  ;;  %2387 = vmatmul.mubr.msk.f32.vlgmr.msra.gmra.mxu0 %vm495_vm1, %v807_v59  ;;  %v2093_v59 = vld [vmem:[%s3259_s1 + $0xd8] sm:$0xff] }
 0x30b   : > { %v743_v61 = vadd.f32 %v2359_v60, %v2047_v53  ;;  %v2092_v60 = vld [vmem:[%s3259_s1 + $0xd0] sm:$0xff] }
 0x30c   : > { %v737_v62 = vpop.f32.mrf.mxu1 }
 0x30d   : > { %v738_v63 = vadd.f32 %v2047_v53, %v737_v62  ;;  %v809_v2 = vmax.f32 %v743_v61, 0.0  ;;  %v2091_v61 = vld [vmem:[%s3259_s1 + $0xc8] sm:$0xff]  ;;  %v2090_v62 = vld [vmem:[%s3259_s1 + $0xc0] sm:$0xff] }
 0x30f   : > { %v808_v0 = vmax.f32 %v738_v63, 0.0  ;;  %v2089_v63 = vld [vmem:[%s3259_s1 + $0xb8] sm:$0xff] }
 0x311   : > { %2389 = vmatprep.mubr.msk.f32.mxu0 %vm495_vm1, %v808_v0  ;;  %v2088_v0 = vld [vmem:[%s3259_s1 + $0xb0] sm:$0xff] }
 0x312   : > { %v2362_v3 = vpop.f32.mrf.mxu1  ;;  %2390 = vmatmul.mubr.msk.f32.gmra.mxu0 %vm495_vm1, %v809_v2  ;;  %v2087_v2 = vld [vmem:[%s3259_s1 + $0xa8] sm:$0xff] }
 0x313   : > { %v753_v4 = vadd.f32 %v2362_v3, %v2047_v53  ;;  %v2086_v3 = vld [vmem:[%s3259_s1 + $0xa0] sm:$0xff] }
 0x314   : > { %v747_v5 = vpop.f32.mrf.mxu1 }
 0x315   : > { %v748_v6 = vadd.f32 %v2047_v53, %v747_v5  ;;  %v811_v8 = vmax.f32 %v753_v4, 0.0  ;;  %v2085_v4 = vld [vmem:[%s3259_s1 + $0x98] sm:$0xff]  ;;  %v2084_v5 = vld [vmem:[%s3259_s1 + $0x90] sm:$0xff] }
 0x317   : > { %v810_v7 = vmax.f32 %v748_v6, 0.0  ;;  %v2083_v6 = vld [vmem:[%s3259_s1 + $0x88] sm:$0xff] }
 0x319   : > { %2392 = vmatprep.mubr.msk.f32.mxu0 %vm495_vm1, %v810_v7  ;;  %v2082_v7 = vld [vmem:[%s3259_s1 + $0x80] sm:$0xff] }
 0x31a   : > { %v2365_v9 = vpop.f32.mrf.mxu1  ;;  %2393 = vmatmul.mubr.msk.f32.gmra.mxu0 %vm495_vm1, %v811_v8 }
 0x31b   : > { %v763_v10 = vadd.f32 %v2365_v9, %v2047_v53  ;;  %v2065_v9 = vld [vmem:[%s3251_s8] ss:$0 sm:$0xff] }
 0x31c   : > { %v757_v11 = vpop.f32.mrf.mxu1 }
 0x31d   : > { %v758_v12 = vadd.f32 %v2047_v53, %v757_v11  ;;  %v813_v14 = vmax.f32 %v763_v10, 0.0 }
 0x31f   : > { %v812_v13 = vmax.f32 %v758_v12, 0.0 }
 0x321   : > { %2395 = vmatprep.mubr.msk.f32.mxu0 %vm495_vm1, %v812_v13 }
 0x322   : > { %v2368_v15 = vpop.f32.mrf.mxu1  ;;  %2396 = vmatmul.mubr.msk.f32.gmra.mxu0 %vm495_vm1, %v813_v14 }
 0x323   : > { %v773_v16 = vadd.f32 %v2368_v15, %v2047_v53 }
 0x324   : > { %v767_v17 = vpop.f32.mrf.mxu1 }
 0x325   : > { %v768_v18 = vadd.f32 %v2047_v53, %v767_v17  ;;  %v815_v20 = vmax.f32 %v773_v16, 0.0 }
 0x327   : > { %v814_v19 = vmax.f32 %v768_v18, 0.0 }
 0x329   : > { %2398 = vmatprep.mubr.msk.f32.mxu0 %vm495_vm1, %v814_v19 }
 0x32a   : > { %v2371_v21 = vpop.f32.mrf.mxu1  ;;  %2399 = vmatmul.mubr.msk.f32.gmra.mxu0 %vm495_vm1, %v815_v20 }
 0x32b   : > { %v783_v22 = vadd.f32 %v2371_v21, %v2047_v53 }
 0x32c   : > { %v777_v23 = vpop.f32.mrf.mxu1 }
 0x32d   : > { %v778_v24 = vadd.f32 %v2047_v53, %v777_v23  ;;  %v817_v26 = vmax.f32 %v783_v22, 0.0 }
 0x32f   : > { %v816_v25 = vmax.f32 %v778_v24, 0.0 }
 0x331   : > { %2401 = vmatprep.mubr.msk.f32.mxu0 %vm495_vm1, %v816_v25 }
 0x332   : > { %v2374_v27 = vpop.f32.mrf.mxu1  ;;  %2402 = vmatmul.mubr.msk.f32.gmra.mxu0 %vm495_vm1, %v817_v26 }
 0x333   : > { %v793_v28 = vadd.f32 %v2374_v27, %v2047_v53 }
 0x334   : > { %v787_v29 = vpop.f32.mrf.mxu1 }
 0x335   : > { %v788_v30 = vadd.f32 %v2047_v53, %v787_v29  ;;  %v819_v32 = vmax.f32 %v793_v28, 0.0 }
 0x337   : > { %v818_v31 = vmax.f32 %v788_v30, 0.0 }
 0x339   : > { %2404 = vmatprep.mubr.msk.f32.mxu0 %vm495_vm1, %v818_v31 }
 0x33a   : > { %v2377_v49 = vpop.f32.mrf.mxu1  ;;  %2405 = vmatmul.mubr.msk.f32.gmra.mxu0 %vm495_vm1, %v819_v32 }
 0x33b   : > { %v803_v50 = vadd.f32 %v2377_v49, %v2047_v53 }
 0x33c   : > { %v797_v51 = vpop.f32.mrf.mxu1 }
 0x33d   : > { %v798_v52 = vadd.f32 %v2047_v53, %v797_v51  ;;  %v821_v55 = vmax.f32 %v803_v50, 0.0  ;;  %v2095_v53 = vld [vmem:[%s3259_s1 + $0xe8] sm:$0xff] }
 0x33e   : > { %2415 = vmatpush3.msra.mxu1 %v2095_v53 }
 0x33f   : > { %v820_v54 = vmax.f32 %v798_v52, 0.0  ;;  %2416 = vmatprep.subr.mxu1 %v2643_v1 }
 0x340   : > { %2417 = vmatpush3.msra.mxu1 %v2094_v58 }
 0x341   : > { %2407 = vmatprep.mubr.msk.f32.mxu0 %vm495_vm1, %v820_v54  ;;  %2418 = vmatprep.subr.mxu1 %v2643_v1 }
 0x342   : > { %2408 = vmatmul.mubr.msk.f32.gmra.mxu0 %vm495_vm1, %v821_v55  ;;  %2419 = vmatpush3.msra.mxu1 %v2093_v59 }
 0x343   : > { %2420 = vmatprep.subr.mxu1 %v2643_v1 }
 0x344   : > { %2421 = vmatpush3.msra.mxu1 %v2092_v60 }
 0x345   : > { %2422 = vmatprep.subr.mxu1 %v2643_v1 }
 0x346   : > { %2423 = vmatpush3.msra.mxu1 %v2091_v61 }
 0x347   : > { %2424 = vmatprep.subr.mxu1 %v2643_v1 }
 0x348   : > { %2425 = vmatpush3.msra.mxu1 %v2090_v62 }
 0x349   : > { %2426 = vmatprep.subr.mxu1 %v2643_v1 }
 0x34a   : > { %2427 = vmatpush3.msra.mxu1 %v2089_v63 }
 0x34b   : > { %2428 = vmatprep.subr.mxu1 %v2643_v1 }
 0x34c   : > { %2429 = vmatpush3.msra.mxu1 %v2088_v0 }
 0x34d   : > { %2430 = vmatprep.subr.mxu1 %v2643_v1 }
 0x34e   : > { %2431 = vmatpush3.msra.mxu1 %v2087_v2 }
 0x34f   : > { %2432 = vmatprep.subr.mxu1 %v2643_v1 }
 0x350   : > { %2433 = vmatpush3.msra.mxu1 %v2086_v3 }
 0x351   : > { %2434 = vmatprep.subr.mxu1 %v2643_v1 }
 0x352   : > { %2435 = vmatpush3.msra.mxu1 %v2085_v4  ;;  %v2104_v4 = vld [vmem:[%s3248_s5 + $0x4] sm:$0xf] }
 0x353   : > { %2436 = vmatprep.subr.mxu1 %v2643_v1 }
 0x354   : > { %2437 = vmatpush3.msra.mxu1 %v2084_v5 }
 0x355   : > { %2438 = vmatprep.subr.mxu1 %v2643_v1 }
 0x356   : > { %2439 = vmatpush3.msra.mxu1 %v2083_v6 }
 0x357   : > { %2440 = vmatprep.subr.mxu1 %v2643_v1 }
 0x358   : > { %2441 = vmatpush3.msra.mxu1 %v2082_v7 }
 0x359   : > { %2445 = vmatprep.subr.mxu1 %v2643_v1 }
 0x3ca   : > { %v2388_v8 = vpop.f32.mrf.mxu0 }
 0x3cb   : > { %v948_v12 = vadd.f32 %v2388_v8, %v2065_v9 }
 0x3cc   : > { %v942_v10 = vpop.f32.mrf.mxu0 }
 0x3cd   : > { %v943_v11 = vadd.f32 %v2065_v9, %v942_v10  ;;  %v1022_v15 = vadd.f32 %v948_v12, %v2860_v34  ;;  %v2108_v10 = vld [vmem:[%s3250_s7 + $0x30] sm:$0xff]  ;;  %v2106_v12 = vld [vmem:[%s3250_s7 + $0x20] sm:$0xff] }
 0x3cf   : > { %v1021_v13 = vadd.f32 %v943_v11, %v2856_v33  ;;  %v2107_v11 = vld [vmem:[%s3250_s7 + $0x28] sm:$0xff] }
 0x3d1   : > { %1037 = vxpose.xlu0.b32.start [1/16] (narrow) %v1021_v13, 8 }
 0x3d2   : > { %v2391_v14 = vpop.f32.mrf.mxu0 }
 0x3d3   : > { %v958_v18 = vadd.f32 %v2391_v14, %v2065_v9 }
 0x3d4   : > { %v952_v16 = vpop.f32.mrf.mxu0 }
 0x3d5   : > { %v953_v17 = vadd.f32 %v2065_v9, %v952_v16  ;;  %1038 = vxpose.xlu0.b32.cont [2/16] (narrow) %v1022_v15, 8  ;;  %v1024_v21 = vadd.f32 %v958_v18, %v2868_v36 }
 0x3d7   : > { %v1023_v19 = vadd.f32 %v953_v17, %v2864_v35 }
 0x3d9   : > { %1039 = vxpose.xlu0.b32.cont [3/16] (narrow) %v1023_v19, 8 }
 0x3da   : > { %v2394_v20 = vpop.f32.mrf.mxu0 }
 0x3db   : > { %v968_v24 = vadd.f32 %v2394_v20, %v2065_v9 }
 0x3dc   : > { %v962_v22 = vpop.f32.mrf.mxu0 }
 0x3dd   : > { %v963_v23 = vadd.f32 %v2065_v9, %v962_v22  ;;  %1040 = vxpose.xlu0.b32.cont [4/16] (narrow) %v1024_v21, 8  ;;  %v1026_v34 = vadd.f32 %v968_v24, %v2876_v38 }
 0x3df   : > { %v1025_v33 = vadd.f32 %v963_v23, %v2872_v37 }
 0x3e1   : > { %1041 = vxpose.xlu0.b32.cont [5/16] (narrow) %v1025_v33, 8 }
 0x3e2   : > { %v2397_v25 = vpop.f32.mrf.mxu0 }
 0x3e3   : > { %v978_v28 = vadd.f32 %v2397_v25, %v2065_v9 }
 0x3e4   : > { %v972_v26 = vpop.f32.mrf.mxu0 }
 0x3e5   : > { %v973_v27 = vadd.f32 %v2065_v9, %v972_v26  ;;  %1042 = vxpose.xlu0.b32.cont [6/16] (narrow) %v1026_v34, 8  ;;  %v1028_v36 = vadd.f32 %v978_v28, %v2884_v40  ;;  %v2114_v28 = vld [vmem:[%s3249_s6 + $0x1] ss:$0 sm:$0xff] }
 0x3e7   : > { %v1027_v35 = vadd.f32 %v973_v27, %v2880_v39  ;;  %v1728_v27 = vld [vmem:[%s3252_s9] sm:$0xf] }
 0x3e9   : > { %1043 = vxpose.xlu0.b32.cont [7/16] (narrow) %v1027_v35, 8 }
 0x3ea   : > { %v2400_v29 = vpop.f32.mrf.mxu0 }
 0x3eb   : > { %v988_v32 = vadd.f32 %v2400_v29, %v2065_v9 }
 0x3ec   : > { %v982_v30 = vpop.f32.mrf.mxu0 }
 0x3ed   : > { %v983_v31 = vadd.f32 %v2065_v9, %v982_v30  ;;  %1044 = vxpose.xlu0.b32.cont [8/16] (narrow) %v1028_v36, 8  ;;  %v1030_v38 = vadd.f32 %v988_v32, %v2892_v42 }
 0x3ef   : > { %v1029_v37 = vadd.f32 %v983_v31, %v2888_v41 }
 0x3f1   : > { %1045 = vxpose.xlu0.b32.cont [9/16] (narrow) %v1029_v37, 8 }
 0x3f2   : > { %v2403_v49 = vpop.f32.mrf.mxu0 }
 0x3f3   : > { %v998_v52 = vadd.f32 %v2403_v49, %v2065_v9 }
 0x3f4   : > { %v992_v50 = vpop.f32.mrf.mxu0 }
 0x3f5   : > { %v993_v51 = vadd.f32 %v2065_v9, %v992_v50  ;;  %1046 = vxpose.xlu0.b32.cont [10/16] (narrow) %v1030_v38, 8  ;;  %v1032_v40 = vadd.f32 %v998_v52, %v2900_v44  ;;  %v2102_v44 = vld [vmem:[%s3246_s3 + $0x38] sm:$0xff] }
 0x3f7   : > { %v1031_v39 = vadd.f32 %v993_v51, %v2896_v43 }
 0x3f9   : > { %1047 = vxpose.xlu0.b32.cont [11/16] (narrow) %v1031_v39, 8 }
 0x3fa   : > { %v2406_v54 = vpop.f32.mrf.mxu0 }
 0x3fb   : > { %v1008_v57 = vadd.f32 %v2406_v54, %v2065_v9 }
 0x3fc   : > { %v1002_v55 = vpop.f32.mrf.mxu0 }
 0x3fd   : > { %v1003_v56 = vadd.f32 %v2065_v9, %v1002_v55  ;;  %1048 = vxpose.xlu0.b32.cont [12/16] (narrow) %v1032_v40, 8  ;;  %v1034_v42 = vadd.f32 %v1008_v57, %v2908_v46  ;;  %v2100_v46 = vld [vmem:[%s3246_s3 + $0x28] sm:$0xff] }
 0x3ff   : > { %v1033_v41 = vadd.f32 %v1003_v56, %v2904_v45  ;;  %v2101_v45 = vld [vmem:[%s3246_s3 + $0x30] sm:$0xff] }
 0x401   : > { %1049 = vxpose.xlu0.b32.cont [13/16] (narrow) %v1033_v41, 8 }
 0x402   : > { %v2409_v53 = vpop.f32.mrf.mxu0 }
 0x403   : > { %v1018_v60 = vadd.f32 %v2409_v53, %v2065_v9 }
 0x404   : > { %v1012_v58 = vpop.f32.mrf.mxu0 }
 0x405   : > { %v1013_v59 = vadd.f32 %v2065_v9, %v1012_v58  ;;  %1050 = vxpose.xlu0.b32.cont [14/16] (narrow) %v1034_v42, 8  ;;  %v1036_v61 = vadd.f32 %v1018_v60, %v2916_v48  ;;  %v2111_v48 = vld [vmem:[%s3245_s2 + $0x1] ss:$0 sm:$0xff]  ;;  %v2109_v9 = vld [vmem:[%s3250_s7 + $0x38] sm:$0xff] }
 0x406   : > { %2482 = vmatprep.subr.mxu0 %v2109_v9 }
 0x407   : > { %v1035_v43 = vadd.f32 %v1013_v59, %v2912_v47  ;;  %v2099_v47 = vld [vmem:[%s3246_s3 + $0x20] sm:$0xff]  ;;  %2483 = vmatpush3.msra.mxu0 %v2109_v9 }
 0x408   : > { %2484 = vmatprep.subr.mxu0 %v2108_v10 }
 0x409   : > { %1051 = vxpose.xlu0.b32.cont [15/16] (narrow) %v1035_v43, 8  ;;  %2485 = vmatpush3.msra.mxu0 %v2108_v10 }
 0x40a   : > { %2486 = vmatprep.subr.mxu0 %v2107_v11 }
 0x40b   : > { %2487 = vmatpush3.msra.mxu0 %v2107_v11 }
 0x40c   : > { %2488 = vmatprep.subr.mxu0 %v2106_v12 }
 0x40d   : > { %1052 = vxpose.xlu0.b32.end [16/16] (narrow) %v1036_v61, 8  ;;  %2489 = vmatpush3.msra.mxu0 %v2106_v12 }
 0x44d   : > { %v1053_v62 = vpop.trf.xlu0 }
 0x44e   : > { %2443 = vmatmul.mubr.f32.vlgmr.msra.gmra.mxu1 %v1053_v62 }
 0x44f   : > { %2446 = vmatpush3.msra.mxu1 %v2102_v44  ;;  %2453 = vmatprep.mubr.msk.f32.mxu1 %vm2644_vm0, %v2643_v1 }
 0x450   : > { %2447 = vmatprep.subr.mxu1 %v2643_v1 }
 0x451   : > { %2448 = vmatpush3.msra.mxu1 %v2101_v45 }
 0x452   : > { %2449 = vmatprep.subr.mxu1 %v2643_v1 }
 0x453   : > { %2450 = vmatpush3.msra.mxu1 %v2100_v46 }
 0x454   : > { %2451 = vmatprep.subr.mxu1 %v2643_v1  ;;  %v2112_v1 = vld [vmem:[%s3247_s4 + $0x1] ss:$0 sm:$0xff] }
 0x455   : > { %2452 = vmatpush3.msra.mxu1 %v2099_v47 }
 0x456   : > { %2456 = vmatprep.subr.msk.mxu1 %vm657_vm2, %v2104_v4 }
 0x50e   : > { %v1178_v63 = vpop.f32.mrf.mxu1 }
 0x50f   : > { %v1179_v0 = vadd.f32 %v2111_v48, %v1178_v63 }
 0x510   : > { %v2444_v2 = vpop.f32.mrf.mxu1 }
 0x511   : > { %v1182_v3 = vmax.f32 %v1179_v0, 0.0 }
 0x513   : > { %2454 = vmatmul.mubr.msk.f32.vlgmr.msra.gmra.mxu1 %vm495_vm1, %v1182_v3 }
 0x514   : > { %2457 = vmatpush3.msk.msra.mxu1 %vm657_vm2, %v2104_v4 }
 0x515   : > { %2514 = vmatprep.subr.msk.mxu1 %vm657_vm2, %v1728_v27 }
 0x5d3   : > { %v1258_v5 = vpop.f32.mrf.mxu1 }
 0x5d4   : > { %v1259_v6 = vadd.f32 %v2112_v1, %v1258_v5 }
 0x5d5   : > { %v2455_v7 = vpop.f32.mrf.mxu1 }
 0x5d6   : > { %v1262_v8 = vadd.f32 %v1259_v6, %v1053_v62 }
 0x5d8   : > { %1263 = vxpose.xlu1.b32.start.end [1/1] (short) %v1262_v8, 128 }
 0x654   : > { %v3077_v13 = vpop.trf.xlu1 }
 0x655   : > { %2458 = vmatprep.mubr.msk.f32.mxu1 %vm608_vm3, %v3077_v13 }
 0x658   : > { %v3081_v14 = vpop.trf.xlu1 }
 0x659   : > { %2459 = vmatmul.mubr.msk.f32.vlgmr.msra.gmra.mxu1 %vm608_vm3, %v3081_v14 }
 0x65a   : > { %2515 = vmatpush3.msk.msra.mxu1 %vm657_vm2, %v1728_v27 }
 0x65c   : > { %v3085_v15 = vpop.trf.xlu1 }
 0x65d   : > { %2461 = vmatprep.mubr.msk.f32.mxu1 %vm608_vm3, %v3085_v15 }
 0x660   : > { %v3089_v16 = vpop.trf.xlu1 }
 0x661   : > { %2462 = vmatmul.mubr.msk.f32.gmra.mxu1 %vm608_vm3, %v3089_v16 }
 0x664   : > { %v3093_v17 = vpop.trf.xlu1 }
 0x665   : > { %2464 = vmatprep.mubr.msk.f32.mxu1 %vm608_vm3, %v3093_v17 }
 0x668   : > { %v3097_v18 = vpop.trf.xlu1 }
 0x669   : > { %2465 = vmatmul.mubr.msk.f32.gmra.mxu1 %vm608_vm3, %v3097_v18 }
 0x66c   : > { %v3101_v19 = vpop.trf.xlu1 }
 0x66d   : > { %2467 = vmatprep.mubr.msk.f32.mxu1 %vm608_vm3, %v3101_v19 }
 0x670   : > { %v3105_v20 = vpop.trf.xlu1 }
 0x671   : > { %2468 = vmatmul.mubr.msk.f32.gmra.mxu1 %vm608_vm3, %v3105_v20 }
 0x674   : > { %v3109_v21 = vpop.trf.xlu1 }
 0x675   : > { %2470 = vmatprep.mubr.msk.f32.mxu1 %vm608_vm3, %v3109_v21 }
 0x678   : > { %v3113_v22 = vpop.trf.xlu1 }
 0x679   : > { %2471 = vmatmul.mubr.msk.f32.gmra.mxu1 %vm608_vm3, %v3113_v22 }
 0x67c   : > { %v3117_v23 = vpop.trf.xlu1 }
 0x67d   : > { %2473 = vmatprep.mubr.msk.f32.mxu1 %vm608_vm3, %v3117_v23 }
 0x680   : > { %v3121_v24 = vpop.trf.xlu1 }
 0x681   : > { %2474 = vmatmul.mubr.msk.f32.gmra.mxu1 %vm608_vm3, %v3121_v24 }
 0x684   : > { %v3125_v33 = vpop.trf.xlu1 }
 0x685   : > { %2476 = vmatprep.mubr.msk.f32.mxu1 %vm608_vm3, %v3125_v33 }
 0x688   : > { %v3129_v25 = vpop.trf.xlu1 }
 0x689   : > { %2477 = vmatmul.mubr.msk.f32.gmra.mxu1 %vm608_vm3, %v3129_v25 }
 0x68c   : > { %v3133_v34 = vpop.trf.xlu1 }
 0x68d   : > { %2479 = vmatprep.mubr.msk.f32.mxu1 %vm608_vm3, %v3133_v34 }
 0x690   : > { %v3137_v26 = vpop.trf.xlu1 }
 0x691   : > { %2480 = vmatmul.mubr.msk.f32.gmra.mxu1 %vm608_vm3, %v3137_v26 }
 0x719   : > { %v2460_v35 = vpop.f32.mrf.mxu1 }
 0x71a   : > { %v1424_v29 = vadd.f32 %v2460_v35, %v2114_v28 }
 0x71b   : > { %v1418_v36 = vpop.f32.mrf.mxu1 }
 0x71c   : > { %v1419_v30 = vadd.f32 %v2114_v28, %v1418_v36  ;;  %v1498_v32 = vmax.f32 %v1424_v29, 0.0  ;;  %v2132_v29 = vld [vmem:[%s3251_s8 + $0x1] ss:$0 sm:$0xff] }
 0x71e   : > { %v1497_v31 = vmax.f32 %v1419_v30, 0.0 }
 0x720   : > { %2490 = vmatprep.mubr.msk.f32.mxu0 %vm495_vm1, %v1497_v31 }
 0x721   : > { %v2463_v37 = vpop.f32.mrf.mxu1  ;;  %2491 = vmatmul.mubr.msk.f32.vlgmr.msra.gmra.mxu0 %vm495_vm1, %v1498_v32 }
 0x722   : > { %v1434_v49 = vadd.f32 %v2463_v37, %v2114_v28 }
 0x723   : > { %v1428_v38 = vpop.f32.mrf.mxu1 }
 0x724   : > { %v1429_v50 = vadd.f32 %v2114_v28, %v1428_v38  ;;  %v1500_v52 = vmax.f32 %v1434_v49, 0.0 }
 0x726   : > { %v1499_v51 = vmax.f32 %v1429_v50, 0.0 }
 0x728   : > { %2493 = vmatprep.mubr.msk.f32.mxu0 %vm495_vm1, %v1499_v51 }
 0x729   : > { %v2466_v39 = vpop.f32.mrf.mxu1  ;;  %2494 = vmatmul.mubr.msk.f32.gmra.mxu0 %vm495_vm1, %v1500_v52 }
 0x72a   : > { %v1444_v54 = vadd.f32 %v2466_v39, %v2114_v28 }
 0x72b   : > { %v1438_v40 = vpop.f32.mrf.mxu1 }
 0x72c   : > { %v1439_v55 = vadd.f32 %v2114_v28, %v1438_v40  ;;  %v1502_v57 = vmax.f32 %v1444_v54, 0.0 }
 0x72e   : > { %v1501_v56 = vmax.f32 %v1439_v55, 0.0 }
 0x730   : > { %2496 = vmatprep.mubr.msk.f32.mxu0 %vm495_vm1, %v1501_v56 }
 0x731   : > { %v2469_v41 = vpop.f32.mrf.mxu1  ;;  %2497 = vmatmul.mubr.msk.f32.gmra.mxu0 %vm495_vm1, %v1502_v57 }
 0x732   : > { %v1454_v53 = vadd.f32 %v2469_v41, %v2114_v28 }
 0x733   : > { %v1448_v42 = vpop.f32.mrf.mxu1 }
 0x734   : > { %v1449_v58 = vadd.f32 %v2114_v28, %v1448_v42  ;;  %v1504_v60 = vmax.f32 %v1454_v53, 0.0 }
 0x736   : > { %v1503_v59 = vmax.f32 %v1449_v58, 0.0 }
 0x738   : > { %2499 = vmatprep.mubr.msk.f32.mxu0 %vm495_vm1, %v1503_v59 }
 0x739   : > { %v2472_v43 = vpop.f32.mrf.mxu1  ;;  %2500 = vmatmul.mubr.msk.f32.gmra.mxu0 %vm495_vm1, %v1504_v60 }
 0x73a   : > { %v1464_v61 = vadd.f32 %v2472_v43, %v2114_v28 }
 0x73b   : > { %v1458_v44 = vpop.f32.mrf.mxu1 }
 0x73c   : > { %v1459_v62 = vadd.f32 %v2114_v28, %v1458_v44  ;;  %v1506_v46 = vmax.f32 %v1464_v61, 0.0 }
 0x73e   : > { %v1505_v45 = vmax.f32 %v1459_v62, 0.0 }
 0x740   : > { %2502 = vmatprep.mubr.msk.f32.mxu0 %vm495_vm1, %v1505_v45 }
 0x741   : > { %v2475_v47 = vpop.f32.mrf.mxu1  ;;  %2503 = vmatmul.mubr.msk.f32.gmra.mxu0 %vm495_vm1, %v1506_v46 }
 0x742   : > { %v1474_v48 = vadd.f32 %v2475_v47, %v2114_v28 }
 0x743   : > { %v1468_v63 = vpop.f32.mrf.mxu1 }
 0x744   : > { %v1469_v0 = vadd.f32 %v2114_v28, %v1468_v63  ;;  %v1508_v3 = vmax.f32 %v1474_v48, 0.0 }
 0x746   : > { %v1507_v2 = vmax.f32 %v1469_v0, 0.0 }
 0x748   : > { %2505 = vmatprep.mubr.msk.f32.mxu0 %vm495_vm1, %v1507_v2 }
 0x749   : > { %v2478_v4 = vpop.f32.mrf.mxu1  ;;  %2506 = vmatmul.mubr.msk.f32.gmra.mxu0 %vm495_vm1, %v1508_v3 }
 0x74a   : > { %v1484_v1 = vadd.f32 %v2478_v4, %v2114_v28 }
 0x74b   : > { %v1478_v5 = vpop.f32.mrf.mxu1 }
 0x74c   : > { %v1479_v6 = vadd.f32 %v2114_v28, %v1478_v5  ;;  %v1510_v8 = vmax.f32 %v1484_v1, 0.0 }
 0x74e   : > { %v1509_v7 = vmax.f32 %v1479_v6, 0.0 }
 0x750   : > { %2508 = vmatprep.mubr.msk.f32.mxu0 %vm495_vm1, %v1509_v7 }
 0x751   : > { %v2481_v9 = vpop.f32.mrf.mxu1  ;;  %2509 = vmatmul.mubr.msk.f32.gmra.mxu0 %vm495_vm1, %v1510_v8 }
 0x752   : > { %v1494_v10 = vadd.f32 %v2481_v9, %v2114_v28 }
 0x753   : > { %v1488_v11 = vpop.f32.mrf.mxu1 }
 0x754   : > { %v1489_v12 = vadd.f32 %v2114_v28, %v1488_v11  ;;  %v1512_v35 = vmax.f32 %v1494_v10, 0.0 }
 0x756   : > { %v1511_v27 = vmax.f32 %v1489_v12, 0.0 }
 0x758   : > { %2511 = vmatprep.mubr.msk.f32.mxu0 %vm495_vm1, %v1511_v27 }
 0x759   : > { %2512 = vmatmul.mubr.msk.f32.gmra.mxu0 %vm495_vm1, %v1512_v35 }
 0x7e1   : > { %v2492_v36 = vpop.f32.mrf.mxu0 }
 0x7e2   : > { %v1639_v30 = vadd.f32 %v2492_v36, %v2132_v29 }
 0x7e3   : > { %v1633_v31 = vpop.f32.mrf.mxu0 }
 0x7e4   : > { %v1634_v32 = vadd.f32 %v2132_v29, %v1633_v31  ;;  %v1713_v49 = vadd.f32 %v1639_v30, %v3081_v14 }
 0x7e6   : > { %v1712_v37 = vadd.f32 %v1634_v32, %v3077_v13 }
 0x7e8   : > { %2516 = vmatprep.mubr.msk.f32.mxu1 %vm608_vm3, %v1712_v37 }
 0x7e9   : > { %v2495_v28 = vpop.f32.mrf.mxu0  ;;  %2517 = vmatmul.mubr.msk.f32.vlgmr.msra.gmra.mxu1 %vm608_vm3, %v1713_v49 }
 0x7ea   : > { %v1649_v38 = vadd.f32 %v2495_v28, %v2132_v29 }
 0x7eb   : > { %v1643_v50 = vpop.f32.mrf.mxu0 }
 0x7ec   : > { %v1644_v51 = vadd.f32 %v2132_v29, %v1643_v50  ;;  %v1715_v39 = vadd.f32 %v1649_v38, %v3089_v16 }
 0x7ee   : > { %v1714_v52 = vadd.f32 %v1644_v51, %v3085_v15 }
 0x7f0   : > { %2519 = vmatprep.mubr.msk.f32.mxu1 %vm608_vm3, %v1714_v52 }
 0x7f1   : > { %v2498_v54 = vpop.f32.mrf.mxu0  ;;  %2520 = vmatmul.mubr.msk.f32.gmra.mxu1 %vm608_vm3, %v1715_v39 }
 0x7f2   : > { %v1659_v13 = vadd.f32 %v2498_v54, %v2132_v29 }
 0x7f3   : > { %v1653_v40 = vpop.f32.mrf.mxu0 }
 0x7f4   : > { %v1654_v14 = vadd.f32 %v2132_v29, %v1653_v40  ;;  %v1717_v56 = vadd.f32 %v1659_v13, %v3097_v18 }
 0x7f6   : > { %v1716_v55 = vadd.f32 %v1654_v14, %v3093_v17 }
 0x7f8   : > { %2522 = vmatprep.mubr.msk.f32.mxu1 %vm608_vm3, %v1716_v55 }
 0x7f9   : > { %v2501_v57 = vpop.f32.mrf.mxu0  ;;  %2523 = vmatmul.mubr.msk.f32.gmra.mxu1 %vm608_vm3, %v1717_v56 }
 0x7fa   : > { %v1669_v15 = vadd.f32 %v2501_v57, %v2132_v29 }
 0x7fb   : > { %v1663_v41 = vpop.f32.mrf.mxu0 }
 0x7fc   : > { %v1664_v16 = vadd.f32 %v2132_v29, %v1663_v41  ;;  %v1719_v42 = vadd.f32 %v1669_v15, %v3105_v20 }
 0x7fe   : > { %v1718_v53 = vadd.f32 %v1664_v16, %v3101_v19 }
 0x800   : > { %2525 = vmatprep.mubr.msk.f32.mxu1 %vm608_vm3, %v1718_v53 }
 0x801   : > { %v2504_v58 = vpop.f32.mrf.mxu0  ;;  %2526 = vmatmul.mubr.msk.f32.gmra.mxu1 %vm608_vm3, %v1719_v42 }
 0x802   : > { %v1679_v17 = vadd.f32 %v2504_v58, %v2132_v29 }
 0x803   : > { %v1673_v59 = vpop.f32.mrf.mxu0 }
 0x804   : > { %v1674_v18 = vadd.f32 %v2132_v29, %v1673_v59  ;;  %v1721_v43 = vadd.f32 %v1679_v17, %v3113_v22 }
 0x806   : > { %v1720_v60 = vadd.f32 %v1674_v18, %v3109_v21 }
 0x808   : > { %2528 = vmatprep.mubr.msk.f32.mxu1 %vm608_vm3, %v1720_v60 }
 0x809   : > { %v2507_v61 = vpop.f32.mrf.mxu0  ;;  %2529 = vmatmul.mubr.msk.f32.gmra.mxu1 %vm608_vm3, %v1721_v43 }
 0x80a   : > { %v1689_v19 = vadd.f32 %v2507_v61, %v2132_v29 }
 0x80b   : > { %v1683_v44 = vpop.f32.mrf.mxu0 }
 0x80c   : > { %v1684_v20 = vadd.f32 %v2132_v29, %v1683_v44  ;;  %v1723_v45 = vadd.f32 %v1689_v19, %v3121_v24 }
 0x80e   : > { %v1722_v62 = vadd.f32 %v1684_v20, %v3117_v23 }
 0x810   : > { %2531 = vmatprep.mubr.msk.f32.mxu1 %vm608_vm3, %v1722_v62 }
 0x811   : > { %v2510_v46 = vpop.f32.mrf.mxu0  ;;  %2532 = vmatmul.mubr.msk.f32.gmra.mxu1 %vm608_vm3, %v1723_v45 }
 0x812   : > { %v1699_v21 = vadd.f32 %v2510_v46, %v2132_v29 }
 0x813   : > { %v1693_v47 = vpop.f32.mrf.mxu0 }
 0x814   : > { %v1694_v22 = vadd.f32 %v2132_v29, %v1693_v47  ;;  %v1725_v63 = vadd.f32 %v1699_v21, %v3129_v25 }
 0x816   : > { %v1724_v48 = vadd.f32 %v1694_v22, %v3125_v33  ;;  %v2149_v33 = vld [vmem:[%s3253_s10] ss:$0 sm:$0xff] }
 0x818   : > { %2534 = vmatprep.mubr.msk.f32.mxu1 %vm608_vm3, %v1724_v48 }
 0x819   : > { %v2513_v0 = vpop.f32.mrf.mxu0  ;;  %2535 = vmatmul.mubr.msk.f32.gmra.mxu1 %vm608_vm3, %v1725_v63 }
 0x81a   : > { %v1709_v23 = vadd.f32 %v2513_v0, %v2132_v29 }
 0x81b   : > { %v1703_v2 = vpop.f32.mrf.mxu0 }
 0x81c   : > { %v1704_v24 = vadd.f32 %v2132_v29, %v1703_v2  ;;  %v1727_v4 = vadd.f32 %v1709_v23, %v3137_v26 }
 0x81e   : > { %v1726_v3 = vadd.f32 %v1704_v24, %v3133_v34 }
 0x820   : > { %2537 = vmatprep.mubr.msk.f32.mxu1 %vm608_vm3, %v1726_v3 }
 0x821   : > { %2538 = vmatmul.mubr.msk.f32.gmra.mxu1 %vm608_vm3, %v1727_v4 }
 0x8a9   : > { %v2518_v1 = vpop.f32.mrf.mxu1 }
 0x8aa   : > { %v1859_v6 = vadd.f32 %v2518_v1, %v2149_v33 }
 0x8ab   : > { %v1853_v25 = vpop.f32.mrf.mxu1 }
 0x8ac   : > { %v1854_v5 = vadd.f32 %v2149_v33, %v1853_v25 }
 0x8ae   : > { %1932 = vxpose.xlu1.b32.start [1/16] (narrow) %v1854_v5, 8 }
 0x8b1   : > { %v2521_v7 = vpop.f32.mrf.mxu1 }
 0x8b2   : > { %1933 = vxpose.xlu1.b32.cont [2/16] (narrow) %v1859_v6, 8  ;;  %v1869_v34 = vadd.f32 %v2521_v7, %v2149_v33 }
 0x8b3   : > { %v1863_v8 = vpop.f32.mrf.mxu1 }
 0x8b4   : > { %v1864_v9 = vadd.f32 %v2149_v33, %v1863_v8 }
 0x8b6   : > { %1934 = vxpose.xlu1.b32.cont [3/16] (narrow) %v1864_v9, 8 }
 0x8b9   : > { %v2524_v26 = vpop.f32.mrf.mxu1 }
 0x8ba   : > { %1935 = vxpose.xlu1.b32.cont [4/16] (narrow) %v1869_v34, 8  ;;  %v1879_v12 = vadd.f32 %v2524_v26, %v2149_v33 }
 0x8bb   : > { %v1873_v10 = vpop.f32.mrf.mxu1 }
 0x8bc   : > { %v1874_v11 = vadd.f32 %v2149_v33, %v1873_v10 }
 0x8be   : > { %1936 = vxpose.xlu1.b32.cont [5/16] (narrow) %v1874_v11, 8 }
 0x8c1   : > { %v2527_v27 = vpop.f32.mrf.mxu1 }
 0x8c2   : > { %1937 = vxpose.xlu1.b32.cont [6/16] (narrow) %v1879_v12, 8  ;;  %v1889_v36 = vadd.f32 %v2527_v27, %v2149_v33 }
 0x8c3   : > { %v1883_v35 = vpop.f32.mrf.mxu1 }
 0x8c4   : > { %v1884_v29 = vadd.f32 %v2149_v33, %v1883_v35 }
 0x8c6   : > { %1938 = vxpose.xlu1.b32.cont [7/16] (narrow) %v1884_v29, 8 }
 0x8c9   : > { %v2530_v30 = vpop.f32.mrf.mxu1 }
 0x8ca   : > { %1939 = vxpose.xlu1.b32.cont [8/16] (narrow) %v1889_v36, 8  ;;  %v1899_v37 = vadd.f32 %v2530_v30, %v2149_v33 }
 0x8cb   : > { %v1893_v31 = vpop.f32.mrf.mxu1 }
 0x8cc   : > { %v1894_v32 = vadd.f32 %v2149_v33, %v1893_v31 }
 0x8ce   : > { %1940 = vxpose.xlu1.b32.cont [9/16] (narrow) %v1894_v32, 8 }
 0x8d1   : > { %v2533_v49 = vpop.f32.mrf.mxu1 }
 0x8d2   : > { %1941 = vxpose.xlu1.b32.cont [10/16] (narrow) %v1899_v37, 8  ;;  %v1909_v50 = vadd.f32 %v2533_v49, %v2149_v33 }
 0x8d3   : > { %v1903_v28 = vpop.f32.mrf.mxu1 }
 0x8d4   : > { %v1904_v38 = vadd.f32 %v2149_v33, %v1903_v28 }
 0x8d6   : > { %1942 = vxpose.xlu1.b32.cont [11/16] (narrow) %v1904_v38, 8 }
 0x8d9   : > { %v2536_v51 = vpop.f32.mrf.mxu1 }
 0x8da   : > { %1943 = vxpose.xlu1.b32.cont [12/16] (narrow) %v1909_v50, 8  ;;  %v1919_v54 = vadd.f32 %v2536_v51, %v2149_v33 }
 0x8db   : > { %v1913_v52 = vpop.f32.mrf.mxu1 }
 0x8dc   : > { %v1914_v39 = vadd.f32 %v2149_v33, %v1913_v52 }
 0x8de   : > { %1944 = vxpose.xlu1.b32.cont [13/16] (narrow) %v1914_v39, 8 }
 0x8e1   : > { %v2539_v13 = vpop.f32.mrf.mxu1 }
 0x8e2   : > { %1945 = vxpose.xlu1.b32.cont [14/16] (narrow) %v1919_v54, 8  ;;  %v1929_v55 = vadd.f32 %v2539_v13, %v2149_v33 }
 0x8e3   : > { %v1923_v40 = vpop.f32.mrf.mxu1 }
 0x8e4   : > { %v1924_v14 = vadd.f32 %v2149_v33, %v1923_v40 }
 0x8e6   : > { %1946 = vxpose.xlu1.b32.cont [15/16] (narrow) %v1924_v14, 8 }
 0x8ea   : > { %1947 = vxpose.xlu1.b32.end [16/16] (narrow) %v1929_v55, 8 }
 0x92a   : > { %v1948_v56 = vpop.trf.xlu1 }
 0x92b   : > { %1964 = vst [vmem:[%s377_s24] sm:$0x3] %v1948_v56 }
 0x92c   : > { %2594 = shalt.err (!%p2591_p3)
}
 0x92d   : > { %s2595_s29 = scalar_lea.hbm %s1977_s13, 32  ;;  %s2599_s22 = scalar_lea.hbm %s3254_s11, 64 }
 0x92e   : > { %p2596_p4 = scmp.ne.s32.totalorder %s1977_s13, %s2595_s29  ;;  %p2600_p9 = scmp.lt.s32.totalorder %s1977_s13, %s3254_s11 }
 0x92f   : > { %p2601_p10 = scmp.lt.s32.totalorder %s2599_s22, %s2595_s29 }
 0x930   : > { %p2597_p7 = pnand %p2596_p4, %p2744_p5 }
 0x931   : > { %p2602_p11 = por %p2601_p10, %p2600_p9 }
 0x932   : > { %p2598_p8 = pneg %p2597_p7 }
 0x934   : > { %p2603_p12 = pnand %p2602_p11, %p2598_p8 }
 0x936   : > { %2606 = shalt.err (!%p2603_p12)
}
 0x937   : > { %2540 = dma.vmem_to_hbm [thread:$0]  (%p2744_p5), %s3205_s25, 32, %s1977_s13, %s1966_s14  }
 0x938 PF: > { %p2546_p13 = scmp.ge.s32.totalorder %s2641_s20, 2  ;;  %s1991_s0 = sand.u32 1, %s2629_s17  }
 0x939   : > { %s1992_s15 = scalar_lea.sflag [#allocation3], %s1991_s0 }
 0x93a   : > { %p2543_p0 = pnand %p2546_p13, %p2748_p6 }
 0x93c   : > { %p2544_p1 = pneg %p2543_p0 }
 0x93e   : > { %2624 = dma.done.wait (%p2544_p1), %s1992_s15, 32  }
 0x93f   : > { %2626 = vsyncadd (%p2544_p1), %s1992_s15, 4294967264  ;;  %p21_p2 = scmp.ge.s32.totalorder %s2731_s23, 4   ;;  %s3261_s17 = smov %s2633_s18 }
 0x940   : > { %s3262_s18 = smov %s2637_s19  ;;  %s3263_s19 = smov %s2742_s26 }
 0x941   : > { %s3264_s20 = smov %s2731_s23  ;;  %23 = sbr.rel (!%p21_p2) target bundleno = 6 (0x6), region = 107 }
 0x946   :  { %1997 = vsyncpa [#allocation3], 1 }
 0x947   :  { %1999 = vsyncpa [#allocation3 + $0x1], 1 }

// kernel: tpu_custom_call.1
= control target key start
LH: loop header
LB: loop body
LE: loop exit
PB: predicated region body
PF: predicated region fallthrough
CT: control target
= control target key end

     0   :  { %s3243_s0 = inlined_call_operand.vmem [shape: f32[2,4,128], index: 0, kind: input, shape index: {}]   ;;  %s3244_s1 = inlined_call_operand.vmem [shape: f32[2,128,32], index: 1, kind: input, shape index: {}]   ;;  %s3245_s2 = inlined_call_operand.vmem [shape: f32[2,1,32], index: 2, kind: input, shape index: {}]   ;;  %s3246_s3 = inlined_call_operand.vmem [shape: f32[2,32,128], index: 3, kind: input, shape index: {}]   ;;  %s3247_s4 = inlined_call_operand.vmem [shape: f32[2,1,128], index: 4, kind: input, shape index: {}]   ;;  %s3248_s5 = inlined_call_operand.vmem [shape: f32[2,4,32], index: 5, kind: input, shape index: {}]   ;;  %s3249_s6 = inlined_call_operand.vmem [shape: f32[2,1,32], index: 6, kind: input, shape index: {}]   ;;  %s3250_s7 = inlined_call_operand.vmem [shape: f32[2,32,4], index: 7, kind: input, shape index: {}]   ;;  %s3251_s8 = inlined_call_operand.vmem [shape: f32[2,1,4], index: 8, kind: input, shape index: {}]   ;;  %s3252_s9 = inlined_call_operand.vmem [shape: f32[4,2], index: 9, kind: input, shape index: {}]   ;;  %s3253_s10 = inlined_call_operand.vmem [shape: f32[1,2], index: 10, kind: input, shape index: {}]   ;;  %s3254_s11 = inlined_call_operand.hbm [shape: f32[2,2,128], index: 11, kind: output, shape index: {}]  }
   0x1   :  { %3255 = sst [smem:[#allocation5_spill]] %s3243_s0 }
   0x2   :  { %3256 = sst [smem:[#allocation6_spill]] %s3244_s1 }
   0x3   :  { %16 = vsyncpa [#allocation3], 0 }
   0x4   :  { %18 = vsyncpa [#allocation3 + $0x1], 0  ;;  %s2706_s17 = smov 0   ;;  %s2708_s18 = smov 0  }
   0x5   :  { %s2710_s19 = smov 0   ;;  %s2712_s20 = smov 0  }
   0x6 LB: > { %s2727_s21 = sadd.s32 4294967295, %s2641_s20   ;;  %s2038_s22 = sadd.s32 4294967294, %s2641_s20   ;;  %s2641_s20 = sphi %s2712_s20, %s3264_s20   ;;  %s2637_s19 = sphi %s2710_s19, %s3263_s19   ;;  %s2633_s18 = sphi %s2708_s18, %s3262_s18   ;;  %s2629_s17 = sphi %s2706_s17, %s3261_s17  }
   0x7   : > { %s2731_s23 = sadd.s32 1, %s2641_s20   ;;  %s267_s24 = sadd.s32 1, %s2637_s19 }
   0x8   : > { %s264_s25 = ssub.s32 %s2641_s20, %s2731_s23  ;;  %p277_p0 = scmp.ne.s32.totalorder %s2637_s19, %s2633_s18 }
   0x9   : > { %p265_p1 = scmp.eq.s32.totalorder %s264_s25, 0  ;;  %p278_p2 = scmp.eq.s32.totalorder %s2727_s21, 1 }
   0xa   : > { %p283_p3 = scmp.ne.s32.totalorder %s2633_s18, %s2629_s17  ;;  %p284_p4 = scmp.eq.s32.totalorder %s2038_s22, 1 }
   0xb   : > { %s2742_s26 = scalar_select %p265_p1, %s2637_s19, %s267_s24  }
   0xc   : > { %p2744_p5 = por %p278_p2, %p277_p0  ;;  %p2748_p6 = por %p284_p4, %p283_p3 }
   0xd   : > { %p2041_p7 = scmp.ge.s32.totalorder %s2641_s20, 1  ;;  %p339_p8 = scmp.lt.s32.totalorder %s2641_s20, 3 }
   0xf   : > { %p340_p9 = pnand %p2041_p7, %p339_p8 }
  0x10   : > { %s3259_s1 = sld [smem:[#allocation6_spill]] (!%p340_p9)  ;;  %p378_p10 = scmp.lt.s32.totalorder (!%p340_p9), %s2727_s21, 1 }
  0x11   : > { %343 = sbr.rel (%p340_p9) target bundleno = 2360 (0x938), region = 64  ;;  %s3260_s0 = sld [smem:[#allocation5_spill]] (!%p340_p9) }
  0x16   : > { %v398_v0 = vld [vmem:[%s3259_s1 + $0x78] sm:$0xff]  ;;  %v2643_v1 = vmov 0.0   ;;  %v397_v2 = vld [vmem:[%s3259_s1 + $0x70] sm:$0xff]  ;;  %vm2644_vm0 = vmmov 0   ;;  %v396_v3 = vld [vmem:[%s3259_s1 + $0x68] sm:$0xff]  ;;  %s379_s12 = scalar_select %p378_p10, %s2727_s21, 1 }
  0x17   : > { %2306 = vmatprep.subr.mxu0 %v2643_v1  ;;  %2338 = vmatprep.mubr.msk.f32.mxu0 %vm2644_vm0, %v2643_v1  ;;  %v395_v4 = vld [vmem:[%s3259_s1 + $0x60] sm:$0xff]  ;;  %v394_v5 = vld [vmem:[%s3259_s1 + $0x58] sm:$0xff]  ;;  %v393_v6 = vld [vmem:[%s3259_s1 + $0x50] sm:$0xff]  ;;  %vm495_vm1 = vcmask 261120   ;;  %vm657_vm2 = vcmask 1043456   ;;  %vm608_vm3 = vcmask 31744  }
  0x18   : > { %2307 = vmatpush3.msra.mxu0 %v398_v0  ;;  %v392_v7 = vld [vmem:[%s3259_s1 + $0x48] sm:$0xff]  ;;  %v391_v8 = vld [vmem:[%s3259_s1 + $0x40] sm:$0xff]  ;;  %v390_v9 = vld [vmem:[%s3259_s1 + $0x38] sm:$0xff]  ;;  %s2043_s22 = sshll.u32 %s379_s12, 2  ;;  %s375_s12 = sand.u32 1, %s2633_s18  }
  0x19   : > { %2308 = vmatprep.subr.mxu0 %v2643_v1  ;;  %v389_v10 = vld [vmem:[%s3259_s1 + $0x30] sm:$0xff]  ;;  %v388_v11 = vld [vmem:[%s3259_s1 + $0x28] sm:$0xff]  ;;  %v387_v12 = vld [vmem:[%s3259_s1 + $0x20] sm:$0xff]  ;;  %s381_s15 = scalar_lea.vmem %s3260_s0, %s2043_s22  ;;  %s2042_s16 = sshll.u32 %s375_s12, 1 }
  0x1a   : > { %2309 = vmatpush3.msra.mxu0 %v397_v2  ;;  %v386_v13 = vld [vmem:[%s3259_s1 + $0x18] sm:$0xff]  ;;  %v385_v14 = vld [vmem:[%s3259_s1 + $0x10] sm:$0xff]  ;;  %v384_v15 = vld [vmem:[%s3259_s1 + $0x8] sm:$0xff]  ;;  %s377_s24 = scalar_lea.vmem [#allocation2], %s2042_s16  ;;  %s2168_s22 = sshll.u32 %s2727_s21, 5 }
  0x1b   : > { %2310 = vmatprep.subr.mxu0 %v2643_v1  ;;  %v383_v16 = vld [vmem:[%s3259_s1] sm:$0xff]  ;;  %v403_v18 = vld [vmem:[%s3246_s3 + $0x18] sm:$0xff]  ;;  %v402_v19 = vld [vmem:[%s3246_s3 + $0x10] sm:$0xff]  ;;  %s1979_s25 = sshll.u32 %s377_s24, 4  ;;  %s1977_s13 = scalar_lea.hbm %s3254_s11, %s2168_s22  ;;  %s3205_s25 = int_to_ptr.vmem [resolvable:$true] %s1979_s25 }
  0x1c   : > { %2311 = vmatpush3.msra.mxu0 %v396_v3  ;;  %v382_v17 = vld [vmem:[%s381_s15] sm:$0xf]  ;;  %v401_v20 = vld [vmem:[%s3246_s3 + $0x8] sm:$0xff]  ;;  %v410_v49 = vld [vmem:[%s3250_s7 + $0x18] sm:$0xff]  ;;  %s1966_s14 = scalar_lea.sflag [#allocation3], %s375_s12  ;;  %s2581_s15 = scalar_lea.vmem %s3205_s25, 32 }
  0x1d   : > { %2312 = vmatprep.subr.mxu0 %v2643_v1  ;;  %v400_v21 = vld [vmem:[%s3246_s3] sm:$0xff]  ;;  %v409_v50 = vld [vmem:[%s3250_s7 + $0x10] sm:$0xff]  ;;  %v408_v51 = vld [vmem:[%s3250_s7 + $0x8] sm:$0xff]  ;;  %p2582_p11 = scmp.ne.s32.totalorder %s3205_s25, %s2581_s15  ;;  %s2645_s16 = smov [#allocation2]  }
  0x1e   : > { %2313 = vmatpush3.msra.mxu0 %v395_v4  ;;  %v2044_v22 = vld [vmem:[%s3245_s2] ss:$0 sm:$0xff]  ;;  %s2585_s0 = sshll.u32 %s2645_s16, 4  ;;  %s2586_s0 = int_to_ptr.vmem [resolvable:$false] %s2585_s0 }
  0x1f   : > { %2314 = vmatprep.subr.mxu0 %v2643_v1  ;;  %v2045_v27 = vld [vmem:[%s3247_s4] ss:$0 sm:$0xff]  ;;  %p2583_p12 = pnand %p2582_p11, %p2744_p5  ;;  %s2587_s21 = scalar_lea.vmem %s2586_s0, 64 }
  0x20   : > { %2315 = vmatpush3.msra.mxu0 %v394_v5  ;;  %v405_v31 = vld [vmem:[%s3248_s5] sm:$0xf]  ;;  %p2588_p0 = scmp.lt.s32.totalorder %s3205_s25, %s2586_s0  ;;  %p2589_p1 = scmp.lt.s32.totalorder %s2587_s21, %s2581_s15 }
  0x21   : > { %2316 = vmatprep.subr.mxu0 %v2643_v1  ;;  %2352 = vmatprep.subr.msk.mxu1 %vm657_vm2, %v405_v31  ;;  %v407_v52 = vld [vmem:[%s3250_s7] sm:$0xff]  ;;  %p2584_p13 = pneg %p2583_p12 }
  0x22   : > { %2317 = vmatpush3.msra.mxu0 %v393_v6  ;;  %2353 = vmatpush3.msk.msra.mxu1 %vm657_vm2, %v405_v31  ;;  %v2047_v53 = vld [vmem:[%s3249_s6] ss:$0 sm:$0xff]  ;;  %p2590_p2 = por %p2589_p1, %p2588_p0 }
  0x23   : > { %2318 = vmatprep.subr.mxu0 %v2643_v1  ;;  %2410 = vmatprep.subr.mxu1 %v2643_v1 }
  0x24   : > { %2319 = vmatpush3.msra.mxu0 %v392_v7  ;;  %p2591_p3 = pnand %p2590_p2, %p2584_p13 }
  0x25   : > { %2320 = vmatprep.subr.mxu0 %v2643_v1 }
  0x26   : > { %2321 = vmatpush3.msra.mxu0 %v391_v8 }
  0x27   : > { %2322 = vmatprep.subr.mxu0 %v2643_v1 }
  0x28   : > { %2323 = vmatpush3.msra.mxu0 %v390_v9 }
  0x29   : > { %2324 = vmatprep.subr.mxu0 %v2643_v1 }
  0x2a   : > { %2325 = vmatpush3.msra.mxu0 %v389_v10 }
  0x2b   : > { %2326 = vmatprep.subr.mxu0 %v2643_v1 }
  0x2c   : > { %2327 = vmatpush3.msra.mxu0 %v388_v11 }
  0x2d   : > { %2328 = vmatprep.subr.mxu0 %v2643_v1 }
  0x2e   : > { %2329 = vmatpush3.msra.mxu0 %v387_v12 }
  0x2f   : > { %2330 = vmatprep.subr.mxu0 %v2643_v1 }
  0x30   : > { %2331 = vmatpush3.msra.mxu0 %v386_v13 }
  0x31   : > { %2332 = vmatprep.subr.mxu0 %v2643_v1 }
  0x32   : > { %2333 = vmatpush3.msra.mxu0 %v385_v14 }
  0x33   : > { %2334 = vmatprep.subr.mxu0 %v2643_v1 }
  0x34   : > { %2335 = vmatpush3.msra.mxu0 %v384_v15 }
  0x35   : > { %2336 = vmatprep.subr.mxu0 %v2643_v1 }
  0x36   : > { %2337 = vmatpush3.msra.mxu0 %v383_v16 }
  0x37   : > { %2339 = vmatmul.mubr.f32.vlgmr.msra.gmra.mxu0 %v382_v17  ;;  %2341 = vmatprep.subr.mxu0 %v2643_v1 }
  0x38   : > { %2342 = vmatpush3.msra.mxu0 %v403_v18  ;;  %2349 = vmatprep.mubr.msk.f32.mxu0 %vm2644_vm0, %v2643_v1 }
  0x39   : > { %2343 = vmatprep.subr.mxu0 %v2643_v1 }
  0x3a   : > { %2344 = vmatpush3.msra.mxu0 %v402_v19 }
  0x3b   : > { %2345 = vmatprep.subr.mxu0 %v2643_v1 }
  0x3c   : > { %2346 = vmatpush3.msra.mxu0 %v401_v20 }
  0x3d   : > { %2347 = vmatprep.subr.mxu0 %v2643_v1 }
  0x3e   : > { %2348 = vmatpush3.msra.mxu0 %v400_v21 }
  0x3f   : > { %2378 = vmatprep.subr.mxu0 %v410_v49 }
  0xf7   : > { %v484_v23 = vpop.f32.mrf.mxu0 }
  0xf8   : > { %v485_v24 = vadd.f32 %v2044_v22, %v484_v23 }
  0xf9   : > { %v2340_v25 = vpop.f32.mrf.mxu0 }
  0xfa   : > { %v488_v26 = vmax.f32 %v485_v24, 0.0 }
  0xfc   : > { %2350 = vmatmul.mubr.msk.f32.vlgmr.msra.gmra.mxu0 %vm495_vm1, %v488_v26 }
  0xfd   : > { %2379 = vmatpush3.msra.mxu0 %v410_v49 }
  0xfe   : > { %2380 = vmatprep.subr.mxu0 %v409_v50 }
  0xff   : > { %2381 = vmatpush3.msra.mxu0 %v409_v50 }
 0x100   : > { %2382 = vmatprep.subr.mxu0 %v408_v51 }
 0x101   : > { %2383 = vmatpush3.msra.mxu0 %v408_v51 }
 0x102   : > { %2384 = vmatprep.subr.mxu0 %v407_v52 }
 0x103   : > { %2385 = vmatpush3.msra.mxu0 %v407_v52 }
 0x1bc   : > { %v565_v28 = vpop.f32.mrf.mxu0 }
 0x1bd   : > { %v566_v29 = vadd.f32 %v2045_v27, %v565_v28 }
 0x1be   : > { %v2351_v30 = vpop.f32.mrf.mxu0 }
 0x1bf   : > { %v569_v32 = vadd.f32 %v566_v29, %v382_v17 }
 0x1c1   : > { %570 = vxpose.xlu0.b32.start.end [1/1] (short) %v569_v32, 128 }
 0x23d   : > { %v2856_v33 = vpop.trf.xlu0 }
 0x23e   : > { %2354 = vmatprep.mubr.msk.f32.mxu1 %vm608_vm3, %v2856_v33 }
 0x241   : > { %v2860_v34 = vpop.trf.xlu0 }
 0x242   : > { %2355 = vmatmul.mubr.msk.f32.vlgmr.msra.gmra.mxu1 %vm608_vm3, %v2860_v34 }
 0x245   : > { %v2864_v35 = vpop.trf.xlu0 }
 0x246   : > { %2357 = vmatprep.mubr.msk.f32.mxu1 %vm608_vm3, %v2864_v35 }
 0x249   : > { %v2868_v36 = vpop.trf.xlu0 }
 0x24a   : > { %2358 = vmatmul.mubr.msk.f32.gmra.mxu1 %vm608_vm3, %v2868_v36 }
 0x24d   : > { %v2872_v37 = vpop.trf.xlu0 }
 0x24e   : > { %2360 = vmatprep.mubr.msk.f32.mxu1 %vm608_vm3, %v2872_v37 }
 0x251   : > { %v2876_v38 = vpop.trf.xlu0 }
 0x252   : > { %2361 = vmatmul.mubr.msk.f32.gmra.mxu1 %vm608_vm3, %v2876_v38 }
 0x255   : > { %v2880_v39 = vpop.trf.xlu0 }
 0x256   : > { %2363 = vmatprep.mubr.msk.f32.mxu1 %vm608_vm3, %v2880_v39 }
 0x259   : > { %v2884_v40 = vpop.trf.xlu0 }
 0x25a   : > { %2364 = vmatmul.mubr.msk.f32.gmra.mxu1 %vm608_vm3, %v2884_v40 }
 0x25d   : > { %v2888_v41 = vpop.trf.xlu0 }
 0x25e   : > { %2366 = vmatprep.mubr.msk.f32.mxu1 %vm608_vm3, %v2888_v41 }
 0x261   : > { %v2892_v42 = vpop.trf.xlu0 }
 0x262   : > { %2367 = vmatmul.mubr.msk.f32.gmra.mxu1 %vm608_vm3, %v2892_v42 }
 0x265   : > { %v2896_v43 = vpop.trf.xlu0 }
 0x266   : > { %2369 = vmatprep.mubr.msk.f32.mxu1 %vm608_vm3, %v2896_v43 }
 0x269   : > { %v2900_v44 = vpop.trf.xlu0 }
 0x26a   : > { %2370 = vmatmul.mubr.msk.f32.gmra.mxu1 %vm608_vm3, %v2900_v44 }
 0x26d   : > { %v2904_v45 = vpop.trf.xlu0 }
 0x26e   : > { %2372 = vmatprep.mubr.msk.f32.mxu1 %vm608_vm3, %v2904_v45 }
 0x271   : > { %v2908_v46 = vpop.trf.xlu0 }
 0x272   : > { %2373 = vmatmul.mubr.msk.f32.gmra.mxu1 %vm608_vm3, %v2908_v46 }
 0x275   : > { %v2912_v47 = vpop.trf.xlu0 }
 0x276   : > { %2375 = vmatprep.mubr.msk.f32.mxu1 %vm608_vm3, %v2912_v47 }
 0x279   : > { %v2916_v48 = vpop.trf.xlu0 }
 0x27a   : > { %2376 = vmatmul.mubr.msk.f32.gmra.mxu1 %vm608_vm3, %v2916_v48 }
 0x27b   : > { %2442 = vmatprep.mubr.msk.f32.mxu1 %vm2644_vm0, %v2643_v1 }
 0x302   : > { %v2356_v54 = vpop.f32.mrf.mxu1 }
 0x303   : > { %v733_v55 = vadd.f32 %v2356_v54, %v2047_v53 }
 0x304   : > { %v727_v56 = vpop.f32.mrf.mxu1 }
 0x305   : > { %v728_v57 = vadd.f32 %v2047_v53, %v727_v56  ;;  %v807_v59 = vmax.f32 %v733_v55, 0.0  ;;  %v2097_v56 = vld [vmem:[%s3259_s1 + $0xf8] sm:$0xff] }
 0x306   : > { %2411 = vmatpush3.msra.mxu1 %v2097_v56 }
 0x307   : > { %v806_v58 = vmax.f32 %v728_v57, 0.0  ;;  %v2096_v57 = vld [vmem:[%s3259_s1 + $0xf0] sm:$0xff]  ;;  %2412 = vmatprep.subr.mxu1 %v2643_v1 }
 0x308   : > { %2413 = vmatpush3.msra.mxu1 %v2096_v57 }
 0x309   : > { %2386 = vmatprep.mubr.msk.f32.mxu0 %vm495_vm1, %v806_v58  ;;  %2414 = vmatprep.subr.mxu1 %v2643_v1  ;;  %v2094_v58 = vld [vmem:[%s3259_s1 + $0xe0] sm:$0xff] }
 0x30a   : > { %v2359_v60 = vpop.f32.mrf.mxu1  ;;  %2387 = vmatmul.mubr.msk.f32.vlgmr.msra.gmra.mxu0 %vm495_vm1, %v807_v59  ;;  %v2093_v59 = vld [vmem:[%s3259_s1 + $0xd8] sm:$0xff] }
 0x30b   : > { %v743_v61 = vadd.f32 %v2359_v60, %v2047_v53  ;;  %v2092_v60 = vld [vmem:[%s3259_s1 + $0xd0] sm:$0xff] }
 0x30c   : > { %v737_v62 = vpop.f32.mrf.mxu1 }
 0x30d   : > { %v738_v63 = vadd.f32 %v2047_v53, %v737_v62  ;;  %v809_v2 = vmax.f32 %v743_v61, 0.0  ;;  %v2091_v61 = vld [vmem:[%s3259_s1 + $0xc8] sm:$0xff]  ;;  %v2090_v62 = vld [vmem:[%s3259_s1 + $0xc0] sm:$0xff] }
 0x30f   : > { %v808_v0 = vmax.f32 %v738_v63, 0.0  ;;  %v2089_v63 = vld [vmem:[%s3259_s1 + $0xb8] sm:$0xff] }
 0x311   : > { %2389 = vmatprep.mubr.msk.f32.mxu0 %vm495_vm1, %v808_v0  ;;  %v2088_v0 = vld [vmem:[%s3259_s1 + $0xb0] sm:$0xff] }
 0x312   : > { %v2362_v3 = vpop.f32.mrf.mxu1  ;;  %2390 = vmatmul.mubr.msk.f32.gmra.mxu0 %vm495_vm1, %v809_v2  ;;  %v2087_v2 = vld [vmem:[%s3259_s1 + $0xa8] sm:$0xff] }
 0x313   : > { %v753_v4 = vadd.f32 %v2362_v3, %v2047_v53  ;;  %v2086_v3 = vld [vmem:[%s3259_s1 + $0xa0] sm:$0xff] }
 0x314   : > { %v747_v5 = vpop.f32.mrf.mxu1 }
 0x315   : > { %v748_v6 = vadd.f32 %v2047_v53, %v747_v5  ;;  %v811_v8 = vmax.f32 %v753_v4, 0.0  ;;  %v2085_v4 = vld [vmem:[%s3259_s1 + $0x98] sm:$0xff]  ;;  %v2084_v5 = vld [vmem:[%s3259_s1 + $0x90] sm:$0xff] }
 0x317   : > { %v810_v7 = vmax.f32 %v748_v6, 0.0  ;;  %v2083_v6 = vld [vmem:[%s3259_s1 + $0x88] sm:$0xff] }
 0x319   : > { %2392 = vmatprep.mubr.msk.f32.mxu0 %vm495_vm1, %v810_v7  ;;  %v2082_v7 = vld [vmem:[%s3259_s1 + $0x80] sm:$0xff] }
 0x31a   : > { %v2365_v9 = vpop.f32.mrf.mxu1  ;;  %2393 = vmatmul.mubr.msk.f32.gmra.mxu0 %vm495_vm1, %v811_v8 }
 0x31b   : > { %v763_v10 = vadd.f32 %v2365_v9, %v2047_v53  ;;  %v2065_v9 = vld [vmem:[%s3251_s8] ss:$0 sm:$0xff] }
 0x31c   : > { %v757_v11 = vpop.f32.mrf.mxu1 }
 0x31d   : > { %v758_v12 = vadd.f32 %v2047_v53, %v757_v11  ;;  %v813_v14 = vmax.f32 %v763_v10, 0.0 }
 0x31f   : > { %v812_v13 = vmax.f32 %v758_v12, 0.0 }
 0x321   : > { %2395 = vmatprep.mubr.msk.f32.mxu0 %vm495_vm1, %v812_v13 }
 0x322   : > { %v2368_v15 = vpop.f32.mrf.mxu1  ;;  %2396 = vmatmul.mubr.msk.f32.gmra.mxu0 %vm495_vm1, %v813_v14 }
 0x323   : > { %v773_v16 = vadd.f32 %v2368_v15, %v2047_v53 }
 0x324   : > { %v767_v17 = vpop.f32.mrf.mxu1 }
 0x325   : > { %v768_v18 = vadd.f32 %v2047_v53, %v767_v17  ;;  %v815_v20 = vmax.f32 %v773_v16, 0.0 }
 0x327   : > { %v814_v19 = vmax.f32 %v768_v18, 0.0 }
 0x329   : > { %2398 = vmatprep.mubr.msk.f32.mxu0 %vm495_vm1, %v814_v19 }
 0x32a   : > { %v2371_v21 = vpop.f32.mrf.mxu1  ;;  %2399 = vmatmul.mubr.msk.f32.gmra.mxu0 %vm495_vm1, %v815_v20 }
 0x32b   : > { %v783_v22 = vadd.f32 %v2371_v21, %v2047_v53 }
 0x32c   : > { %v777_v23 = vpop.f32.mrf.mxu1 }
 0x32d   : > { %v778_v24 = vadd.f32 %v2047_v53, %v777_v23  ;;  %v817_v26 = vmax.f32 %v783_v22, 0.0 }
 0x32f   : > { %v816_v25 = vmax.f32 %v778_v24, 0.0 }
 0x331   : > { %2401 = vmatprep.mubr.msk.f32.mxu0 %vm495_vm1, %v816_v25 }
 0x332   : > { %v2374_v27 = vpop.f32.mrf.mxu1  ;;  %2402 = vmatmul.mubr.msk.f32.gmra.mxu0 %vm495_vm1, %v817_v26 }
 0x333   : > { %v793_v28 = vadd.f32 %v2374_v27, %v2047_v53 }
 0x334   : > { %v787_v29 = vpop.f32.mrf.mxu1 }
 0x335   : > { %v788_v30 = vadd.f32 %v2047_v53, %v787_v29  ;;  %v819_v32 = vmax.f32 %v793_v28, 0.0 }
 0x337   : > { %v818_v31 = vmax.f32 %v788_v30, 0.0 }
 0x339   : > { %2404 = vmatprep.mubr.msk.f32.mxu0 %vm495_vm1, %v818_v31 }
 0x33a   : > { %v2377_v49 = vpop.f32.mrf.mxu1  ;;  %2405 = vmatmul.mubr.msk.f32.gmra.mxu0 %vm495_vm1, %v819_v32 }
 0x33b   : > { %v803_v50 = vadd.f32 %v2377_v49, %v2047_v53 }
 0x33c   : > { %v797_v51 = vpop.f32.mrf.mxu1 }
 0x33d   : > { %v798_v52 = vadd.f32 %v2047_v53, %v797_v51  ;;  %v821_v55 = vmax.f32 %v803_v50, 0.0  ;;  %v2095_v53 = vld [vmem:[%s3259_s1 + $0xe8] sm:$0xff] }
 0x33e   : > { %2415 = vmatpush3.msra.mxu1 %v2095_v53 }
 0x33f   : > { %v820_v54 = vmax.f32 %v798_v52, 0.0  ;;  %2416 = vmatprep.subr.mxu1 %v2643_v1 }
 0x340   : > { %2417 = vmatpush3.msra.mxu1 %v2094_v58 }
 0x341   : > { %2407 = vmatprep.mubr.msk.f32.mxu0 %vm495_vm1, %v820_v54  ;;  %2418 = vmatprep.subr.mxu1 %v2643_v1 }
 0x342   : > { %2408 = vmatmul.mubr.msk.f32.gmra.mxu0 %vm495_vm1, %v821_v55  ;;  %2419 = vmatpush3.msra.mxu1 %v2093_v59 }
 0x343   : > { %2420 = vmatprep.subr.mxu1 %v2643_v1 }
 0x344   : > { %2421 = vmatpush3.msra.mxu1 %v2092_v60 }
 0x345   : > { %2422 = vmatprep.subr.mxu1 %v2643_v1 }
 0x346   : > { %2423 = vmatpush3.msra.mxu1 %v2091_v61 }
 0x347   : > { %2424 = vmatprep.subr.mxu1 %v2643_v1 }
 0x348   : > { %2425 = vmatpush3.msra.mxu1 %v2090_v62 }
 0x349   : > { %2426 = vmatprep.subr.mxu1 %v2643_v1 }
 0x34a   : > { %2427 = vmatpush3.msra.mxu1 %v2089_v63 }
 0x34b   : > { %2428 = vmatprep.subr.mxu1 %v2643_v1 }
 0x34c   : > { %2429 = vmatpush3.msra.mxu1 %v2088_v0 }
 0x34d   : > { %2430 = vmatprep.subr.mxu1 %v2643_v1 }
 0x34e   : > { %2431 = vmatpush3.msra.mxu1 %v2087_v2 }
 0x34f   : > { %2432 = vmatprep.subr.mxu1 %v2643_v1 }
 0x350   : > { %2433 = vmatpush3.msra.mxu1 %v2086_v3 }
 0x351   : > { %2434 = vmatprep.subr.mxu1 %v2643_v1 }
 0x352   : > { %2435 = vmatpush3.msra.mxu1 %v2085_v4  ;;  %v2104_v4 = vld [vmem:[%s3248_s5 + $0x4] sm:$0xf] }
 0x353   : > { %2436 = vmatprep.subr.mxu1 %v2643_v1 }
 0x354   : > { %2437 = vmatpush3.msra.mxu1 %v2084_v5 }
 0x355   : > { %2438 = vmatprep.subr.mxu1 %v2643_v1 }
 0x356   : > { %2439 = vmatpush3.msra.mxu1 %v2083_v6 }
 0x357   : > { %2440 = vmatprep.subr.mxu1 %v2643_v1 }
 0x358   : > { %2441 = vmatpush3.msra.mxu1 %v2082_v7 }
 0x359   : > { %2445 = vmatprep.subr.mxu1 %v2643_v1 }
 0x3ca   : > { %v2388_v8 = vpop.f32.mrf.mxu0 }
 0x3cb   : > { %v948_v12 = vadd.f32 %v2388_v8, %v2065_v9 }
 0x3cc   : > { %v942_v10 = vpop.f32.mrf.mxu0 }
 0x3cd   : > { %v943_v11 = vadd.f32 %v2065_v9, %v942_v10  ;;  %v1022_v15 = vadd.f32 %v948_v12, %v2860_v34  ;;  %v2108_v10 = vld [vmem:[%s3250_s7 + $0x30] sm:$0xff]  ;;  %v2106_v12 = vld [vmem:[%s3250_s7 + $0x20] sm:$0xff] }
 0x3cf   : > { %v1021_v13 = vadd.f32 %v943_v11, %v2856_v33  ;;  %v2107_v11 = vld [vmem:[%s3250_s7 + $0x28] sm:$0xff] }
 0x3d1   : > { %1037 = vxpose.xlu0.b32.start [1/16] (narrow) %v1021_v13, 8 }
 0x3d2   : > { %v2391_v14 = vpop.f32.mrf.mxu0 }
 0x3d3   : > { %v958_v18 = vadd.f32 %v2391_v14, %v2065_v9 }
 0x3d4   : > { %v952_v16 = vpop.f32.mrf.mxu0 }
 0x3d5   : > { %v953_v17 = vadd.f32 %v2065_v9, %v952_v16  ;;  %1038 = vxpose.xlu0.b32.cont [2/16] (narrow) %v1022_v15, 8  ;;  %v1024_v21 = vadd.f32 %v958_v18, %v2868_v36 }
 0x3d7   : > { %v1023_v19 = vadd.f32 %v953_v17, %v2864_v35 }
 0x3d9   : > { %1039 = vxpose.xlu0.b32.cont [3/16] (narrow) %v1023_v19, 8 }
 0x3da   : > { %v2394_v20 = vpop.f32.mrf.mxu0 }
 0x3db   : > { %v968_v24 = vadd.f32 %v2394_v20, %v2065_v9 }
 0x3dc   : > { %v962_v22 = vpop.f32.mrf.mxu0 }
 0x3dd   : > { %v963_v23 = vadd.f32 %v2065_v9, %v962_v22  ;;  %1040 = vxpose.xlu0.b32.cont [4/16] (narrow) %v1024_v21, 8  ;;  %v1026_v34 = vadd.f32 %v968_v24, %v2876_v38 }
 0x3df   : > { %v1025_v33 = vadd.f32 %v963_v23, %v2872_v37 }
 0x3e1   : > { %1041 = vxpose.xlu0.b32.cont [5/16] (narrow) %v1025_v33, 8 }
 0x3e2   : > { %v2397_v25 = vpop.f32.mrf.mxu0 }
 0x3e3   : > { %v978_v28 = vadd.f32 %v2397_v25, %v2065_v9 }
 0x3e4   : > { %v972_v26 = vpop.f32.mrf.mxu0 }
 0x3e5   : > { %v973_v27 = vadd.f32 %v2065_v9, %v972_v26  ;;  %1042 = vxpose.xlu0.b32.cont [6/16] (narrow) %v1026_v34, 8  ;;  %v1028_v36 = vadd.f32 %v978_v28, %v2884_v40  ;;  %v2114_v28 = vld [vmem:[%s3249_s6 + $0x1] ss:$0 sm:$0xff] }
 0x3e7   : > { %v1027_v35 = vadd.f32 %v973_v27, %v2880_v39  ;;  %v1728_v27 = vld [vmem:[%s3252_s9] sm:$0xf] }
 0x3e9   : > { %1043 = vxpose.xlu0.b32.cont [7/16] (narrow) %v1027_v35, 8 }
 0x3ea   : > { %v2400_v29 = vpop.f32.mrf.mxu0 }
 0x3eb   : > { %v988_v32 = vadd.f32 %v2400_v29, %v2065_v9 }
 0x3ec   : > { %v982_v30 = vpop.f32.mrf.mxu0 }
 0x3ed   : > { %v983_v31 = vadd.f32 %v2065_v9, %v982_v30  ;;  %1044 = vxpose.xlu0.b32.cont [8/16] (narrow) %v1028_v36, 8  ;;  %v1030_v38 = vadd.f32 %v988_v32, %v2892_v42 }
 0x3ef   : > { %v1029_v37 = vadd.f32 %v983_v31, %v2888_v41 }
 0x3f1   : > { %1045 = vxpose.xlu0.b32.cont [9/16] (narrow) %v1029_v37, 8 }
 0x3f2   : > { %v2403_v49 = vpop.f32.mrf.mxu0 }
 0x3f3   : > { %v998_v52 = vadd.f32 %v2403_v49, %v2065_v9 }
 0x3f4   : > { %v992_v50 = vpop.f32.mrf.mxu0 }
 0x3f5   : > { %v993_v51 = vadd.f32 %v2065_v9, %v992_v50  ;;  %1046 = vxpose.xlu0.b32.cont [10/16] (narrow) %v1030_v38, 8  ;;  %v1032_v40 = vadd.f32 %v998_v52, %v2900_v44  ;;  %v2102_v44 = vld [vmem:[%s3246_s3 + $0x38] sm:$0xff] }
 0x3f7   : > { %v1031_v39 = vadd.f32 %v993_v51, %v2896_v43 }
 0x3f9   : > { %1047 = vxpose.xlu0.b32.cont [11/16] (narrow) %v1031_v39, 8 }
 0x3fa   : > { %v2406_v54 = vpop.f32.mrf.mxu0 }
 0x3fb   : > { %v1008_v57 = vadd.f32 %v2406_v54, %v2065_v9 }
 0x3fc   : > { %v1002_v55 = vpop.f32.mrf.mxu0 }
 0x3fd   : > { %v1003_v56 = vadd.f32 %v2065_v9, %v1002_v55  ;;  %1048 = vxpose.xlu0.b32.cont [12/16] (narrow) %v1032_v40, 8  ;;  %v1034_v42 = vadd.f32 %v1008_v57, %v2908_v46  ;;  %v2100_v46 = vld [vmem:[%s3246_s3 + $0x28] sm:$0xff] }
 0x3ff   : > { %v1033_v41 = vadd.f32 %v1003_v56, %v2904_v45  ;;  %v2101_v45 = vld [vmem:[%s3246_s3 + $0x30] sm:$0xff] }
 0x401   : > { %1049 = vxpose.xlu0.b32.cont [13/16] (narrow) %v1033_v41, 8 }
 0x402   : > { %v2409_v53 = vpop.f32.mrf.mxu0 }
 0x403   : > { %v1018_v60 = vadd.f32 %v2409_v53, %v2065_v9 }
 0x404   : > { %v1012_v58 = vpop.f32.mrf.mxu0 }
 0x405   : > { %v1013_v59 = vadd.f32 %v2065_v9, %v1012_v58  ;;  %1050 = vxpose.xlu0.b32.cont [14/16] (narrow) %v1034_v42, 8  ;;  %v1036_v61 = vadd.f32 %v1018_v60, %v2916_v48  ;;  %v2111_v48 = vld [vmem:[%s3245_s2 + $0x1] ss:$0 sm:$0xff]  ;;  %v2109_v9 = vld [vmem:[%s3250_s7 + $0x38] sm:$0xff] }
 0x406   : > { %2482 = vmatprep.subr.mxu0 %v2109_v9 }
 0x407   : > { %v1035_v43 = vadd.f32 %v1013_v59, %v2912_v47  ;;  %v2099_v47 = vld [vmem:[%s3246_s3 + $0x20] sm:$0xff]  ;;  %2483 = vmatpush3.msra.mxu0 %v2109_v9 }
 0x408   : > { %2484 = vmatprep.subr.mxu0 %v2108_v10 }
 0x409   : > { %1051 = vxpose.xlu0.b32.cont [15/16] (narrow) %v1035_v43, 8  ;;  %2485 = vmatpush3.msra.mxu0 %v2108_v10 }
 0x40a   : > { %2486 = vmatprep.subr.mxu0 %v2107_v11 }
 0x40b   : > { %2487 = vmatpush3.msra.mxu0 %v2107_v11 }
 0x40c   : > { %2488 = vmatprep.subr.mxu0 %v2106_v12 }
 0x40d   : > { %1052 = vxpose.xlu0.b32.end [16/16] (narrow) %v1036_v61, 8  ;;  %2489 = vmatpush3.msra.mxu0 %v2106_v12 }
 0x44d   : > { %v1053_v62 = vpop.trf.xlu0 }
 0x44e   : > { %2443 = vmatmul.mubr.f32.vlgmr.msra.gmra.mxu1 %v1053_v62 }
 0x44f   : > { %2446 = vmatpush3.msra.mxu1 %v2102_v44  ;;  %2453 = vmatprep.mubr.msk.f32.mxu1 %vm2644_vm0, %v2643_v1 }
 0x450   : > { %2447 = vmatprep.subr.mxu1 %v2643_v1 }
 0x451   : > { %2448 = vmatpush3.msra.mxu1 %v2101_v45 }
 0x452   : > { %2449 = vmatprep.subr.mxu1 %v2643_v1 }
 0x453   : > { %2450 = vmatpush3.msra.mxu1 %v2100_v46 }
 0x454   : > { %2451 = vmatprep.subr.mxu1 %v2643_v1  ;;  %v2112_v1 = vld [vmem:[%s3247_s4 + $0x1] ss:$0 sm:$0xff] }
 0x455   : > { %2452 = vmatpush3.msra.mxu1 %v2099_v47 }
 0x456   : > { %2456 = vmatprep.subr.msk.mxu1 %vm657_vm2, %v2104_v4 }
 0x50e   : > { %v1178_v63 = vpop.f32.mrf.mxu1 }
 0x50f   : > { %v1179_v0 = vadd.f32 %v2111_v48, %v1178_v63 }
 0x510   : > { %v2444_v2 = vpop.f32.mrf.mxu1 }
 0x511   : > { %v1182_v3 = vmax.f32 %v1179_v0, 0.0 }
 0x513   : > { %2454 = vmatmul.mubr.msk.f32.vlgmr.msra.gmra.mxu1 %vm495_vm1, %v1182_v3 }
 0x514   : > { %2457 = vmatpush3.msk.msra.mxu1 %vm657_vm2, %v2104_v4 }
 0x515   : > { %2514 = vmatprep.subr.msk.mxu1 %vm657_vm2, %v1728_v27 }
 0x5d3   : > { %v1258_v5 = vpop.f32.mrf.mxu1 }
 0x5d4   : > { %v1259_v6 = vadd.f32 %v2112_v1, %v1258_v5 }
 0x5d5   : > { %v2455_v7 = vpop.f32.mrf.mxu1 }
 0x5d6   : > { %v1262_v8 = vadd.f32 %v1259_v6, %v1053_v62 }
 0x5d8   : > { %1263 = vxpose.xlu1.b32.start.end [1/1] (short) %v1262_v8, 128 }
 0x654   : > { %v3077_v13 = vpop.trf.xlu1 }
 0x655   : > { %2458 = vmatprep.mubr.msk.f32.mxu1 %vm608_vm3, %v3077_v13 }
 0x658   : > { %v3081_v14 = vpop.trf.xlu1 }
 0x659   : > { %2459 = vmatmul.mubr.msk.f32.vlgmr.msra.gmra.mxu1 %vm608_vm3, %v3081_v14 }
 0x65a   : > { %2515 = vmatpush3.msk.msra.mxu1 %vm657_vm2, %v1728_v27 }
 0x65c   : > { %v3085_v15 = vpop.trf.xlu1 }
 0x65d   : > { %2461 = vmatprep.mubr.msk.f32.mxu1 %vm608_vm3, %v3085_v15 }
 0x660   : > { %v3089_v16 = vpop.trf.xlu1 }
 0x661   : > { %2462 = vmatmul.mubr.msk.f32.gmra.mxu1 %vm608_vm3, %v3089_v16 }
 0x664   : > { %v3093_v17 = vpop.trf.xlu1 }
 0x665   : > { %2464 = vmatprep.mubr.msk.f32.mxu1 %vm608_vm3, %v3093_v17 }
 0x668   : > { %v3097_v18 = vpop.trf.xlu1 }
 0x669   : > { %2465 = vmatmul.mubr.msk.f32.gmra.mxu1 %vm608_vm3, %v3097_v18 }
 0x66c   : > { %v3101_v19 = vpop.trf.xlu1 }
 0x66d   : > { %2467 = vmatprep.mubr.msk.f32.mxu1 %vm608_vm3, %v3101_v19 }
 0x670   : > { %v3105_v20 = vpop.trf.xlu1 }
 0x671   : > { %2468 = vmatmul.mubr.msk.f32.gmra.mxu1 %vm608_vm3, %v3105_v20 }
 0x674   : > { %v3109_v21 = vpop.trf.xlu1 }
 0x675   : > { %2470 = vmatprep.mubr.msk.f32.mxu1 %vm608_vm3, %v3109_v21 }
 0x678   : > { %v3113_v22 = vpop.trf.xlu1 }
 0x679   : > { %2471 = vmatmul.mubr.msk.f32.gmra.mxu1 %vm608_vm3, %v3113_v22 }
 0x67c   : > { %v3117_v23 = vpop.trf.xlu1 }
 0x67d   : > { %2473 = vmatprep.mubr.msk.f32.mxu1 %vm608_vm3, %v3117_v23 }
 0x680   : > { %v3121_v24 = vpop.trf.xlu1 }
 0x681   : > { %2474 = vmatmul.mubr.msk.f32.gmra.mxu1 %vm608_vm3, %v3121_v24 }
 0x684   : > { %v3125_v33 = vpop.trf.xlu1 }
 0x685   : > { %2476 = vmatprep.mubr.msk.f32.mxu1 %vm608_vm3, %v3125_v33 }
 0x688   : > { %v3129_v25 = vpop.trf.xlu1 }
 0x689   : > { %2477 = vmatmul.mubr.msk.f32.gmra.mxu1 %vm608_vm3, %v3129_v25 }
 0x68c   : > { %v3133_v34 = vpop.trf.xlu1 }
 0x68d   : > { %2479 = vmatprep.mubr.msk.f32.mxu1 %vm608_vm3, %v3133_v34 }
 0x690   : > { %v3137_v26 = vpop.trf.xlu1 }
 0x691   : > { %2480 = vmatmul.mubr.msk.f32.gmra.mxu1 %vm608_vm3, %v3137_v26 }
 0x719   : > { %v2460_v35 = vpop.f32.mrf.mxu1 }
 0x71a   : > { %v1424_v29 = vadd.f32 %v2460_v35, %v2114_v28 }
 0x71b   : > { %v1418_v36 = vpop.f32.mrf.mxu1 }
 0x71c   : > { %v1419_v30 = vadd.f32 %v2114_v28, %v1418_v36  ;;  %v1498_v32 = vmax.f32 %v1424_v29, 0.0  ;;  %v2132_v29 = vld [vmem:[%s3251_s8 + $0x1] ss:$0 sm:$0xff] }
 0x71e   : > { %v1497_v31 = vmax.f32 %v1419_v30, 0.0 }
 0x720   : > { %2490 = vmatprep.mubr.msk.f32.mxu0 %vm495_vm1, %v1497_v31 }
 0x721   : > { %v2463_v37 = vpop.f32.mrf.mxu1  ;;  %2491 = vmatmul.mubr.msk.f32.vlgmr.msra.gmra.mxu0 %vm495_vm1, %v1498_v32 }
 0x722   : > { %v1434_v49 = vadd.f32 %v2463_v37, %v2114_v28 }
 0x723   : > { %v1428_v38 = vpop.f32.mrf.mxu1 }
 0x724   : > { %v1429_v50 = vadd.f32 %v2114_v28, %v1428_v38  ;;  %v1500_v52 = vmax.f32 %v1434_v49, 0.0 }
 0x726   : > { %v1499_v51 = vmax.f32 %v1429_v50, 0.0 }
 0x728   : > { %2493 = vmatprep.mubr.msk.f32.mxu0 %vm495_vm1, %v1499_v51 }
 0x729   : > { %v2466_v39 = vpop.f32.mrf.mxu1  ;;  %2494 = vmatmul.mubr.msk.f32.gmra.mxu0 %vm495_vm1, %v1500_v52 }
 0x72a   : > { %v1444_v54 = vadd.f32 %v2466_v39, %v2114_v28 }
 0x72b   : > { %v1438_v40 = vpop.f32.mrf.mxu1 }
 0x72c   : > { %v1439_v55 = vadd.f32 %v2114_v28, %v1438_v40  ;;  %v1502_v57 = vmax.f32 %v1444_v54, 0.0 }
 0x72e   : > { %v1501_v56 = vmax.f32 %v1439_v55, 0.0 }
 0x730   : > { %2496 = vmatprep.mubr.msk.f32.mxu0 %vm495_vm1, %v1501_v56 }
 0x731   : > { %v2469_v41 = vpop.f32.mrf.mxu1  ;;  %2497 = vmatmul.mubr.msk.f32.gmra.mxu0 %vm495_vm1, %v1502_v57 }
 0x732   : > { %v1454_v53 = vadd.f32 %v2469_v41, %v2114_v28 }
 0x733   : > { %v1448_v42 = vpop.f32.mrf.mxu1 }
 0x734   : > { %v1449_v58 = vadd.f32 %v2114_v28, %v1448_v42  ;;  %v1504_v60 = vmax.f32 %v1454_v53, 0.0 }
 0x736   : > { %v1503_v59 = vmax.f32 %v1449_v58, 0.0 }
 0x738   : > { %2499 = vmatprep.mubr.msk.f32.mxu0 %vm495_vm1, %v1503_v59 }
 0x739   : > { %v2472_v43 = vpop.f32.mrf.mxu1  ;;  %2500 = vmatmul.mubr.msk.f32.gmra.mxu0 %vm495_vm1, %v1504_v60 }
 0x73a   : > { %v1464_v61 = vadd.f32 %v2472_v43, %v2114_v28 }
 0x73b   : > { %v1458_v44 = vpop.f32.mrf.mxu1 }
 0x73c   : > { %v1459_v62 = vadd.f32 %v2114_v28, %v1458_v44  ;;  %v1506_v46 = vmax.f32 %v1464_v61, 0.0 }
 0x73e   : > { %v1505_v45 = vmax.f32 %v1459_v62, 0.0 }
 0x740   : > { %2502 = vmatprep.mubr.msk.f32.mxu0 %vm495_vm1, %v1505_v45 }
 0x741   : > { %v2475_v47 = vpop.f32.mrf.mxu1  ;;  %2503 = vmatmul.mubr.msk.f32.gmra.mxu0 %vm495_vm1, %v1506_v46 }
 0x742   : > { %v1474_v48 = vadd.f32 %v2475_v47, %v2114_v28 }
 0x743   : > { %v1468_v63 = vpop.f32.mrf.mxu1 }
 0x744   : > { %v1469_v0 = vadd.f32 %v2114_v28, %v1468_v63  ;;  %v1508_v3 = vmax.f32 %v1474_v48, 0.0 }
 0x746   : > { %v1507_v2 = vmax.f32 %v1469_v0, 0.0 }
 0x748   : > { %2505 = vmatprep.mubr.msk.f32.mxu0 %vm495_vm1, %v1507_v2 }
 0x749   : > { %v2478_v4 = vpop.f32.mrf.mxu1  ;;  %2506 = vmatmul.mubr.msk.f32.gmra.mxu0 %vm495_vm1, %v1508_v3 }
 0x74a   : > { %v1484_v1 = vadd.f32 %v2478_v4, %v2114_v28 }
 0x74b   : > { %v1478_v5 = vpop.f32.mrf.mxu1 }
 0x74c   : > { %v1479_v6 = vadd.f32 %v2114_v28, %v1478_v5  ;;  %v1510_v8 = vmax.f32 %v1484_v1, 0.0 }
 0x74e   : > { %v1509_v7 = vmax.f32 %v1479_v6, 0.0 }
 0x750   : > { %2508 = vmatprep.mubr.msk.f32.mxu0 %vm495_vm1, %v1509_v7 }
 0x751   : > { %v2481_v9 = vpop.f32.mrf.mxu1  ;;  %2509 = vmatmul.mubr.msk.f32.gmra.mxu0 %vm495_vm1, %v1510_v8 }
 0x752   : > { %v1494_v10 = vadd.f32 %v2481_v9, %v2114_v28 }
 0x753   : > { %v1488_v11 = vpop.f32.mrf.mxu1 }
 0x754   : > { %v1489_v12 = vadd.f32 %v2114_v28, %v1488_v11  ;;  %v1512_v35 = vmax.f32 %v1494_v10, 0.0 }
 0x756   : > { %v1511_v27 = vmax.f32 %v1489_v12, 0.0 }
 0x758   : > { %2511 = vmatprep.mubr.msk.f32.mxu0 %vm495_vm1, %v1511_v27 }
 0x759   : > { %2512 = vmatmul.mubr.msk.f32.gmra.mxu0 %vm495_vm1, %v1512_v35 }
 0x7e1   : > { %v2492_v36 = vpop.f32.mrf.mxu0 }
 0x7e2   : > { %v1639_v30 = vadd.f32 %v2492_v36, %v2132_v29 }
 0x7e3   : > { %v1633_v31 = vpop.f32.mrf.mxu0 }
 0x7e4   : > { %v1634_v32 = vadd.f32 %v2132_v29, %v1633_v31  ;;  %v1713_v49 = vadd.f32 %v1639_v30, %v3081_v14 }
 0x7e6   : > { %v1712_v37 = vadd.f32 %v1634_v32, %v3077_v13 }
 0x7e8   : > { %2516 = vmatprep.mubr.msk.f32.mxu1 %vm608_vm3, %v1712_v37 }
 0x7e9   : > { %v2495_v28 = vpop.f32.mrf.mxu0  ;;  %2517 = vmatmul.mubr.msk.f32.vlgmr.msra.gmra.mxu1 %vm608_vm3, %v1713_v49 }
 0x7ea   : > { %v1649_v38 = vadd.f32 %v2495_v28, %v2132_v29 }
 0x7eb   : > { %v1643_v50 = vpop.f32.mrf.mxu0 }
 0x7ec   : > { %v1644_v51 = vadd.f32 %v2132_v29, %v1643_v50  ;;  %v1715_v39 = vadd.f32 %v1649_v38, %v3089_v16 }
 0x7ee   : > { %v1714_v52 = vadd.f32 %v1644_v51, %v3085_v15 }
 0x7f0   : > { %2519 = vmatprep.mubr.msk.f32.mxu1 %vm608_vm3, %v1714_v52 }
 0x7f1   : > { %v2498_v54 = vpop.f32.mrf.mxu0  ;;  %2520 = vmatmul.mubr.msk.f32.gmra.mxu1 %vm608_vm3, %v1715_v39 }
 0x7f2   : > { %v1659_v13 = vadd.f32 %v2498_v54, %v2132_v29 }
 0x7f3   : > { %v1653_v40 = vpop.f32.mrf.mxu0 }
 0x7f4   : > { %v1654_v14 = vadd.f32 %v2132_v29, %v1653_v40  ;;  %v1717_v56 = vadd.f32 %v1659_v13, %v3097_v18 }
 0x7f6   : > { %v1716_v55 = vadd.f32 %v1654_v14, %v3093_v17 }
 0x7f8   : > { %2522 = vmatprep.mubr.msk.f32.mxu1 %vm608_vm3, %v1716_v55 }
 0x7f9   : > { %v2501_v57 = vpop.f32.mrf.mxu0  ;;  %2523 = vmatmul.mubr.msk.f32.gmra.mxu1 %vm608_vm3, %v1717_v56 }
 0x7fa   : > { %v1669_v15 = vadd.f32 %v2501_v57, %v2132_v29 }
 0x7fb   : > { %v1663_v41 = vpop.f32.mrf.mxu0 }
 0x7fc   : > { %v1664_v16 = vadd.f32 %v2132_v29, %v1663_v41  ;;  %v1719_v42 = vadd.f32 %v1669_v15, %v3105_v20 }
 0x7fe   : > { %v1718_v53 = vadd.f32 %v1664_v16, %v3101_v19 }
 0x800   : > { %2525 = vmatprep.mubr.msk.f32.mxu1 %vm608_vm3, %v1718_v53 }
 0x801   : > { %v2504_v58 = vpop.f32.mrf.mxu0  ;;  %2526 = vmatmul.mubr.msk.f32.gmra.mxu1 %vm608_vm3, %v1719_v42 }
 0x802   : > { %v1679_v17 = vadd.f32 %v2504_v58, %v2132_v29 }
 0x803   : > { %v1673_v59 = vpop.f32.mrf.mxu0 }
 0x804   : > { %v1674_v18 = vadd.f32 %v2132_v29, %v1673_v59  ;;  %v1721_v43 = vadd.f32 %v1679_v17, %v3113_v22 }
 0x806   : > { %v1720_v60 = vadd.f32 %v1674_v18, %v3109_v21 }
 0x808   : > { %2528 = vmatprep.mubr.msk.f32.mxu1 %vm608_vm3, %v1720_v60 }
 0x809   : > { %v2507_v61 = vpop.f32.mrf.mxu0  ;;  %2529 = vmatmul.mubr.msk.f32.gmra.mxu1 %vm608_vm3, %v1721_v43 }
 0x80a   : > { %v1689_v19 = vadd.f32 %v2507_v61, %v2132_v29 }
 0x80b   : > { %v1683_v44 = vpop.f32.mrf.mxu0 }
 0x80c   : > { %v1684_v20 = vadd.f32 %v2132_v29, %v1683_v44  ;;  %v1723_v45 = vadd.f32 %v1689_v19, %v3121_v24 }
 0x80e   : > { %v1722_v62 = vadd.f32 %v1684_v20, %v3117_v23 }
 0x810   : > { %2531 = vmatprep.mubr.msk.f32.mxu1 %vm608_vm3, %v1722_v62 }
 0x811   : > { %v2510_v46 = vpop.f32.mrf.mxu0  ;;  %2532 = vmatmul.mubr.msk.f32.gmra.mxu1 %vm608_vm3, %v1723_v45 }
 0x812   : > { %v1699_v21 = vadd.f32 %v2510_v46, %v2132_v29 }
 0x813   : > { %v1693_v47 = vpop.f32.mrf.mxu0 }
 0x814   : > { %v1694_v22 = vadd.f32 %v2132_v29, %v1693_v47  ;;  %v1725_v63 = vadd.f32 %v1699_v21, %v3129_v25 }
 0x816   : > { %v1724_v48 = vadd.f32 %v1694_v22, %v3125_v33  ;;  %v2149_v33 = vld [vmem:[%s3253_s10] ss:$0 sm:$0xff] }
 0x818   : > { %2534 = vmatprep.mubr.msk.f32.mxu1 %vm608_vm3, %v1724_v48 }
 0x819   : > { %v2513_v0 = vpop.f32.mrf.mxu0  ;;  %2535 = vmatmul.mubr.msk.f32.gmra.mxu1 %vm608_vm3, %v1725_v63 }
 0x81a   : > { %v1709_v23 = vadd.f32 %v2513_v0, %v2132_v29 }
 0x81b   : > { %v1703_v2 = vpop.f32.mrf.mxu0 }
 0x81c   : > { %v1704_v24 = vadd.f32 %v2132_v29, %v1703_v2  ;;  %v1727_v4 = vadd.f32 %v1709_v23, %v3137_v26 }
 0x81e   : > { %v1726_v3 = vadd.f32 %v1704_v24, %v3133_v34 }
 0x820   : > { %2537 = vmatprep.mubr.msk.f32.mxu1 %vm608_vm3, %v1726_v3 }
 0x821   : > { %2538 = vmatmul.mubr.msk.f32.gmra.mxu1 %vm608_vm3, %v1727_v4 }
 0x8a9   : > { %v2518_v1 = vpop.f32.mrf.mxu1 }
 0x8aa   : > { %v1859_v6 = vadd.f32 %v2518_v1, %v2149_v33 }
 0x8ab   : > { %v1853_v25 = vpop.f32.mrf.mxu1 }
 0x8ac   : > { %v1854_v5 = vadd.f32 %v2149_v33, %v1853_v25 }
 0x8ae   : > { %1932 = vxpose.xlu1.b32.start [1/16] (narrow) %v1854_v5, 8 }
 0x8b1   : > { %v2521_v7 = vpop.f32.mrf.mxu1 }
 0x8b2   : > { %1933 = vxpose.xlu1.b32.cont [2/16] (narrow) %v1859_v6, 8  ;;  %v1869_v34 = vadd.f32 %v2521_v7, %v2149_v33 }
 0x8b3   : > { %v1863_v8 = vpop.f32.mrf.mxu1 }
 0x8b4   : > { %v1864_v9 = vadd.f32 %v2149_v33, %v1863_v8 }
 0x8b6   : > { %1934 = vxpose.xlu1.b32.cont [3/16] (narrow) %v1864_v9, 8 }
 0x8b9   : > { %v2524_v26 = vpop.f32.mrf.mxu1 }
 0x8ba   : > { %1935 = vxpose.xlu1.b32.cont [4/16] (narrow) %v1869_v34, 8  ;;  %v1879_v12 = vadd.f32 %v2524_v26, %v2149_v33 }
 0x8bb   : > { %v1873_v10 = vpop.f32.mrf.mxu1 }
 0x8bc   : > { %v1874_v11 = vadd.f32 %v2149_v33, %v1873_v10 }
 0x8be   : > { %1936 = vxpose.xlu1.b32.cont [5/16] (narrow) %v1874_v11, 8 }
 0x8c1   : > { %v2527_v27 = vpop.f32.mrf.mxu1 }
 0x8c2   : > { %1937 = vxpose.xlu1.b32.cont [6/16] (narrow) %v1879_v12, 8  ;;  %v1889_v36 = vadd.f32 %v2527_v27, %v2149_v33 }
 0x8c3   : > { %v1883_v35 = vpop.f32.mrf.mxu1 }
 0x8c4   : > { %v1884_v29 = vadd.f32 %v2149_v33, %v1883_v35 }
 0x8c6   : > { %1938 = vxpose.xlu1.b32.cont [7/16] (narrow) %v1884_v29, 8 }
 0x8c9   : > { %v2530_v30 = vpop.f32.mrf.mxu1 }
 0x8ca   : > { %1939 = vxpose.xlu1.b32.cont [8/16] (narrow) %v1889_v36, 8  ;;  %v1899_v37 = vadd.f32 %v2530_v30, %v2149_v33 }
 0x8cb   : > { %v1893_v31 = vpop.f32.mrf.mxu1 }
 0x8cc   : > { %v1894_v32 = vadd.f32 %v2149_v33, %v1893_v31 }
 0x8ce   : > { %1940 = vxpose.xlu1.b32.cont [9/16] (narrow) %v1894_v32, 8 }
 0x8d1   : > { %v2533_v49 = vpop.f32.mrf.mxu1 }
 0x8d2   : > { %1941 = vxpose.xlu1.b32.cont [10/16] (narrow) %v1899_v37, 8  ;;  %v1909_v50 = vadd.f32 %v2533_v49, %v2149_v33 }
 0x8d3   : > { %v1903_v28 = vpop.f32.mrf.mxu1 }
 0x8d4   : > { %v1904_v38 = vadd.f32 %v2149_v33, %v1903_v28 }
 0x8d6   : > { %1942 = vxpose.xlu1.b32.cont [11/16] (narrow) %v1904_v38, 8 }
 0x8d9   : > { %v2536_v51 = vpop.f32.mrf.mxu1 }
 0x8da   : > { %1943 = vxpose.xlu1.b32.cont [12/16] (narrow) %v1909_v50, 8  ;;  %v1919_v54 = vadd.f32 %v2536_v51, %v2149_v33 }
 0x8db   : > { %v1913_v52 = vpop.f32.mrf.mxu1 }
 0x8dc   : > { %v1914_v39 = vadd.f32 %v2149_v33, %v1913_v52 }
 0x8de   : > { %1944 = vxpose.xlu1.b32.cont [13/16] (narrow) %v1914_v39, 8 }
 0x8e1   : > { %v2539_v13 = vpop.f32.mrf.mxu1 }
 0x8e2   : > { %1945 = vxpose.xlu1.b32.cont [14/16] (narrow) %v1919_v54, 8  ;;  %v1929_v55 = vadd.f32 %v2539_v13, %v2149_v33 }
 0x8e3   : > { %v1923_v40 = vpop.f32.mrf.mxu1 }
 0x8e4   : > { %v1924_v14 = vadd.f32 %v2149_v33, %v1923_v40 }
 0x8e6   : > { %1946 = vxpose.xlu1.b32.cont [15/16] (narrow) %v1924_v14, 8 }
 0x8ea   : > { %1947 = vxpose.xlu1.b32.end [16/16] (narrow) %v1929_v55, 8 }
 0x92a   : > { %v1948_v56 = vpop.trf.xlu1 }
 0x92b   : > { %1964 = vst [vmem:[%s377_s24] sm:$0x3] %v1948_v56 }
 0x92c   : > { %2594 = shalt.err (!%p2591_p3)
}
 0x92d   : > { %s2595_s29 = scalar_lea.hbm %s1977_s13, 32  ;;  %s2599_s22 = scalar_lea.hbm %s3254_s11, 64 }
 0x92e   : > { %p2596_p4 = scmp.ne.s32.totalorder %s1977_s13, %s2595_s29  ;;  %p2600_p9 = scmp.lt.s32.totalorder %s1977_s13, %s3254_s11 }
 0x92f   : > { %p2601_p10 = scmp.lt.s32.totalorder %s2599_s22, %s2595_s29 }
 0x930   : > { %p2597_p7 = pnand %p2596_p4, %p2744_p5 }
 0x931   : > { %p2602_p11 = por %p2601_p10, %p2600_p9 }
 0x932   : > { %p2598_p8 = pneg %p2597_p7 }
 0x934   : > { %p2603_p12 = pnand %p2602_p11, %p2598_p8 }
 0x936   : > { %2606 = shalt.err (!%p2603_p12)
}
 0x937   : > { %2540 = dma.vmem_to_hbm [thread:$0]  (%p2744_p5), %s3205_s25, 32, %s1977_s13, %s1966_s14  }
 0x938 PF: > { %p2546_p13 = scmp.ge.s32.totalorder %s2641_s20, 2  ;;  %s1991_s0 = sand.u32 1, %s2629_s17  }
 0x939   : > { %s1992_s15 = scalar_lea.sflag [#allocation3], %s1991_s0 }
 0x93a   : > { %p2543_p0 = pnand %p2546_p13, %p2748_p6 }
 0x93c   : > { %p2544_p1 = pneg %p2543_p0 }
 0x93e   : > { %2624 = dma.done.wait (%p2544_p1), %s1992_s15, 32  }
 0x93f   : > { %2626 = vsyncadd (%p2544_p1), %s1992_s15, 4294967264  ;;  %p21_p2 = scmp.ge.s32.totalorder %s2731_s23, 4   ;;  %s3261_s17 = smov %s2633_s18 }
 0x940   : > { %s3262_s18 = smov %s2637_s19  ;;  %s3263_s19 = smov %s2742_s26 }
 0x941   : > { %s3264_s20 = smov %s2731_s23  ;;  %23 = sbr.rel (!%p21_p2) target bundleno = 6 (0x6), region = 107 }
 0x946   :  { %1997 = vsyncpa [#allocation3], 1 }
 0x947   :  { %1999 = vsyncpa [#allocation3 + $0x1], 1 }

</bundles_post_ra>
